<compile_context>
chip_gen: v7x
topology: tpu7x:2x2x1
jax: 0.10.0
libtpu: 0.0.40
codegen_flags: <defaults>
</compile_context>

<pallas_src>
import math
import functools

import jax
import jax.numpy as jnp
from jax.experimental import pallas as pl
from jax.experimental.pallas import tpu as pltpu

# ----------------------------- model config ---------------------------------
HID_DIM = 32        # d_model
NHEADS = 4
FF_DIM = 64         # dim_feedforward
N_LAYERS = 2        # n_xfmer_encoder_layers
MAX_LEN = 256
SEQ = 8
BATCH = 2
LN_EPS = 1e-5       # PyTorch LayerNorm default

# TODO(synk): dropout layers are treated as identity (eval-mode semantics);
# PyTorch training-mode dropout masks are not reproduced.


# ------------------------------ kernel ---------------------------------------
def _layernorm(y, w, b):
    mu = jnp.mean(y, axis=-1, keepdims=True)
    var = jnp.mean((y - mu) ** 2, axis=-1, keepdims=True)
    return (y - mu) * jax.lax.rsqrt(var + LN_EPS) * w + b


def _fused_encoder_kernel(n_layers, nheads, batch, seq,
                          x_ref, pe_ref,
                          wqkv_ref, bqkv_ref, wo_ref, bo_ref,
                          w1_ref, b1_ref, w2_ref, b2_ref,
                          ln1w_ref, ln1b_ref, ln2w_ref, ln2b_ref,
                          o_ref):
    """Positional encoding + N post-norm TransformerEncoderLayers, fused.

    x_ref / pe_ref / o_ref : (B*S, D) float32, rows ordered batch-major.
    Weight refs carry a leading N_LAYERS dim and are pre-transposed so every
    projection is a plain `x @ w` (no in-kernel transposes).
    """
    BS, D = x_ref.shape
    B, S, H = batch, seq, nheads
    dh = D // H
    attn_scale = jnp.float32(1.0 / math.sqrt(dh))

    # ---- positional encoding: x * sqrt(D) + pe (pe pre-tiled to (B*S, D)) ----
    h2d = x_ref[...] * jnp.float32(math.sqrt(D)) + pe_ref[...]

    for l in range(n_layers):                      # short, fully unrolled
        wqkv_t = wqkv_ref[l]                       # (D, 3D)
        bqkv = bqkv_ref[l]                         # (1, 3D)
        wo_t = wo_ref[l]                           # (D, D)
        bo = bo_ref[l]                             # (1, D)
        w1_t = w1_ref[l]                           # (D, FF)
        b1 = b1_ref[l]                             # (1, FF)
        w2_t = w2_ref[l]                           # (FF, D)
        b2 = b2_ref[l]                             # (1, D)
        ln1w = ln1w_ref[l]; ln1b = ln1b_ref[l]     # (1, D)
        ln2w = ln2w_ref[l]; ln2b = ln2b_ref[l]     # (1, D)

        # ---- multi-head self-attention (batched over B via einsum) ----
        qkv = jnp.dot(h2d, wqkv_t, preferred_element_type=jnp.float32) + bqkv  # (B*S, 3D)
        qkv3 = qkv.reshape(B, S, 3 * D)            # tile-aligned leading split

        ctx_heads = []
        for h in range(H):                         # 4 iterations, unrolled
            q_h = qkv3[:, :, h * dh:(h + 1) * dh]                  # (B, S, dh)
            k_h = qkv3[:, :, D + h * dh:D + (h + 1) * dh]
            v_h = qkv3[:, :, 2 * D + h * dh:2 * D + (h + 1) * dh]
            s = jnp.einsum('bqd,bkd->bqk', q_h, k_h,
                           preferred_element_type=jnp.float32) * attn_scale
            m = jnp.max(s, axis=-1, keepdims=True)
            e = jnp.exp(s - m)
            p = e / jnp.sum(e, axis=-1, keepdims=True)             # softmax
            ctx_heads.append(jnp.einsum('bqk,bkd->bqd', p, v_h,
                                        preferred_element_type=jnp.float32))
        ctx = jnp.concatenate(ctx_heads, axis=-1).reshape(BS, D)   # (B*S, D)
        attn_out = jnp.dot(ctx, wo_t, preferred_element_type=jnp.float32) + bo

        # ---- residual + LayerNorm 1 (post-norm) ----
        y = _layernorm(h2d + attn_out, ln1w, ln1b)

        # ---- feed-forward (ReLU) ----
        f = jnp.dot(y, w1_t, preferred_element_type=jnp.float32) + b1
        f = jnp.maximum(f, 0.0)
        f = jnp.dot(f, w2_t, preferred_element_type=jnp.float32) + b2

        # ---- residual + LayerNorm 2 ----
        h2d = _layernorm(y + f, ln2w, ln2b)

    o_ref[...] = h2d.astype(o_ref.dtype)


# ------------------------------ wrapper --------------------------------------
@jax.jit
def transformer_encoder(x, pe, stacked):
    """x: (S, B, D) float32, seq-first like the PyTorch module."""
    S, B, D = x.shape
    # lane-dense 2-D activation layout, batch-major rows
    x2d = jnp.transpose(x, (1, 0, 2)).reshape(B * S, D)
    pe2d = jnp.broadcast_to(pe[:S][None, :, :], (B, S, D)).reshape(B * S, D)

    kernel = functools.partial(_fused_encoder_kernel, N_LAYERS, NHEADS, B, S)
    vmem = pl.BlockSpec(memory_space=pltpu.MemorySpace.VMEM)

    out2d = pl.pallas_call(
        kernel,
        out_shape=jax.ShapeDtypeStruct((B * S, D), x.dtype),
        in_specs=[vmem] * 14,
        out_specs=vmem,
    )(x2d, pe2d,
      stacked["wqkv_t"], stacked["bqkv"], stacked["wo_t"], stacked["bo"],
      stacked["w1_t"], stacked["b1"], stacked["w2_t"], stacked["b2"],
      stacked["ln1w"], stacked["ln1b"], stacked["ln2w"], stacked["ln2b"])

    return jnp.transpose(out2d.reshape(B, S, D), (1, 0, 2))        # (S, B, D)


# ------------------------------ parameter setup ------------------------------
def make_positional_encoding(max_len, d_model):
    assert d_model % 2 == 0, "interleaved sin/cos PE requires even d_model"
    position = jnp.arange(max_len, dtype=jnp.float32)[:, None]           # (L,1)
    div_term = jnp.exp(jnp.arange(0, d_model, 2, dtype=jnp.float32)
                       * (-math.log(10000.0) / d_model))                 # (D/2,)
    pe_sin = jnp.sin(position * div_term)
    pe_cos = jnp.cos(position * div_term)
    pe = jnp.stack([pe_sin, pe_cos], axis=-1).reshape(max_len, d_model)  # interleave
    return pe.astype(jnp.float32)


def init_layer_params(key, d_model, ff_dim):
    """PyTorch-layout parameters for one nn.TransformerEncoderLayer."""
    ks = jax.random.split(key, 6)
    s = 0.05
    return {
        "wqkv": s * jax.random.normal(ks[0], (3 * d_model, d_model), jnp.float32),
        "bqkv": s * jax.random.normal(ks[1], (3 * d_model,), jnp.float32),
        "wo":   s * jax.random.normal(ks[2], (d_model, d_model), jnp.float32),
        "bo":   s * jax.random.normal(ks[3], (d_model,), jnp.float32),
        "w1":   s * jax.random.normal(ks[4], (ff_dim, d_model), jnp.float32),
        "b1":   jnp.zeros((ff_dim,), jnp.float32),
        "w2":   s * jax.random.normal(ks[5], (d_model, ff_dim), jnp.float32),
        "b2":   jnp.zeros((d_model,), jnp.float32),
        "ln1w": jnp.ones((d_model,), jnp.float32),
        "ln1b": jnp.zeros((d_model,), jnp.float32),
        "ln2w": jnp.ones((d_model,), jnp.float32),
        "ln2b": jnp.zeros((d_model,), jnp.float32),
    }


def stack_layer_params(layer_params):
    """Pre-transpose weights and stack all layers along a leading axis."""
    def stk(fn):
        return jnp.stack([fn(p) for p in layer_params], axis=0)
    return {
        "wqkv_t": stk(lambda p: p["wqkv"].T),              # (L, D, 3D)
        "bqkv":   stk(lambda p: p["bqkv"][None, :]),       # (L, 1, 3D)
        "wo_t":   stk(lambda p: p["wo"].T),                # (L, D, D)
        "bo":     stk(lambda p: p["bo"][None, :]),         # (L, 1, D)
        "w1_t":   stk(lambda p: p["w1"].T),                # (L, D, FF)
        "b1":     stk(lambda p: p["b1"][None, :]),         # (L, 1, FF)
        "w2_t":   stk(lambda p: p["w2"].T),                # (L, FF, D)
        "b2":     stk(lambda p: p["b2"][None, :]),         # (L, 1, D)
        "ln1w":   stk(lambda p: p["ln1w"][None, :]),       # (L, 1, D)
        "ln1b":   stk(lambda p: p["ln1b"][None, :]),
        "ln2w":   stk(lambda p: p["ln2w"][None, :]),
        "ln2b":   stk(lambda p: p["ln2b"][None, :]),
    }


# ------------------------------ pure-JAX reference ---------------------------
def _ln_ref(y, w, b):
    mu = jnp.mean(y, axis=-1, keepdims=True)
    var = jnp.mean((y - mu) ** 2, axis=-1, keepdims=True)
    return (y - mu) * jax.lax.rsqrt(var + LN_EPS) * w + b


def reference_forward(x, pe, layer_params):
    """Straightforward (S, B, D) per-batch/per-head implementation."""
    S, B, D = x.shape
    H, dh = NHEADS, D // NHEADS
    h = x * math.sqrt(D) + pe[:S][:, None, :]
    for p in layer_params:
        outs = []
        for b in range(B):
            xb = h[:, b, :]
            qkv = xb @ p["wqkv"].T + p["bqkv"]
            heads = []
            for hh in range(H):
                q = qkv[:, hh * dh:(hh + 1) * dh]
                k = qkv[:, D + hh * dh:D + (hh + 1) * dh]
                v = qkv[:, 2 * D + hh * dh:2 * D + (hh + 1) * dh]
                s = (q @ k.T) / math.sqrt(dh)
                heads.append(jax.nn.softmax(s, axis=-1) @ v)
            ctx = jnp.concatenate(heads, axis=-1)
            attn = ctx @ p["wo"].T + p["bo"]
            y = _ln_ref(xb + attn, p["ln1w"], p["ln1b"])
            f = jnp.maximum(y @ p["w1"].T + p["b1"], 0.0)
            f = f @ p["w2"].T + p["b2"]
            outs.append(_ln_ref(y + f, p["ln2w"], p["ln2b"]))
        h = jnp.stack(outs, axis=1)
    return h


# ------------------------------ main ------------------------------------------
if __name__ == "__main__":
    key = jax.random.PRNGKey(0)
    kx, kp = jax.random.split(key)

    x = jax.random.normal(kx, (SEQ, BATCH, HID_DIM), jnp.float32)   # (S, B, D)
    pe = make_positional_encoding(MAX_LEN, HID_DIM)

    layer_keys = jax.random.split(kp, N_LAYERS)
    layer_params = [init_layer_params(k, HID_DIM, FF_DIM) for k in layer_keys]
    stacked = stack_layer_params(layer_params)

    out = transformer_encoder(x, pe, stacked)
    jax.block_until_ready(out)
    assert out.shape == (SEQ, BATCH, HID_DIM) and out.dtype == jnp.float32

    ref = reference_forward(x, pe, layer_params)
    assert jnp.allclose(out, ref, rtol=1e-3, atol=1e-3), "mismatch vs reference"

    print("KERNEL_OK")
</pallas_src>

<mosaic_0001>
module attributes {stable_mosaic.version = 11 : i64} {
  func.func @_fused_encoder_kernel(%arg0: memref<16x32xf32, #tpu.memory_space<vmem>>, %arg1: memref<16x32xf32, #tpu.memory_space<vmem>>, %arg2: memref<2x32x96xf32, #tpu.memory_space<vmem>>, %arg3: memref<2x1x96xf32, #tpu.memory_space<vmem>>, %arg4: memref<2x32x32xf32, #tpu.memory_space<vmem>>, %arg5: memref<2x1x32xf32, #tpu.memory_space<vmem>>, %arg6: memref<2x32x64xf32, #tpu.memory_space<vmem>>, %arg7: memref<2x1x64xf32, #tpu.memory_space<vmem>>, %arg8: memref<2x64x32xf32, #tpu.memory_space<vmem>>, %arg9: memref<2x1x32xf32, #tpu.memory_space<vmem>>, %arg10: memref<2x1x32xf32, #tpu.memory_space<vmem>>, %arg11: memref<2x1x32xf32, #tpu.memory_space<vmem>>, %arg12: memref<2x1x32xf32, #tpu.memory_space<vmem>>, %arg13: memref<2x1x32xf32, #tpu.memory_space<vmem>>, %arg14: memref<16x32xf32, #tpu.memory_space<vmem>>) attributes {dimension_semantics = [], scalar_prefetch = 0 : i64, scratch_operands = 0 : i64, tpu.core_type = #tpu.core_type<tc>} {
    %c0 = arith.constant 0 : index
    %c0_0 = arith.constant 0 : index
    %0 = vector.load %arg0[%c0, %c0_0] : memref<16x32xf32, #tpu.memory_space<vmem>>, vector<16x32xf32>
    %cst = arith.constant 5.65685415 : f32
    %1 = vector.broadcast %cst : f32 to vector<16x32xf32>
    %2 = arith.mulf %0, %1 : vector<16x32xf32>
    %c0_1 = arith.constant 0 : index
    %c0_2 = arith.constant 0 : index
    %3 = vector.load %arg1[%c0_1, %c0_2] : memref<16x32xf32, #tpu.memory_space<vmem>>, vector<16x32xf32>
    %4 = arith.addf %2, %3 : vector<16x32xf32>
    %c0_3 = arith.constant 0 : index
    %c0_4 = arith.constant 0 : index
    %c0_5 = arith.constant 0 : index
    %5 = vector.load %arg2[%c0_3, %c0_4, %c0_5] : memref<2x32x96xf32, #tpu.memory_space<vmem>>, vector<1x32x96xf32>
    %6 = vector.shape_cast %5 : vector<1x32x96xf32> to vector<32x96xf32>
    %c0_6 = arith.constant 0 : index
    %c0_7 = arith.constant 0 : index
    %c0_8 = arith.constant 0 : index
    %7 = vector.load %arg3[%c0_6, %c0_7, %c0_8] : memref<2x1x96xf32, #tpu.memory_space<vmem>>, vector<1x1x96xf32>
    %8 = vector.shape_cast %7 : vector<1x1x96xf32> to vector<1x96xf32>
    %c0_9 = arith.constant 0 : index
    %c0_10 = arith.constant 0 : index
    %c0_11 = arith.constant 0 : index
    %9 = vector.load %arg4[%c0_9, %c0_10, %c0_11] : memref<2x32x32xf32, #tpu.memory_space<vmem>>, vector<1x32x32xf32>
    %10 = vector.shape_cast %9 : vector<1x32x32xf32> to vector<32x32xf32>
    %c0_12 = arith.constant 0 : index
    %c0_13 = arith.constant 0 : index
    %c0_14 = arith.constant 0 : index
    %11 = vector.load %arg5[%c0_12, %c0_13, %c0_14] : memref<2x1x32xf32, #tpu.memory_space<vmem>>, vector<1x1x32xf32>
    %12 = vector.shape_cast %11 : vector<1x1x32xf32> to vector<1x32xf32>
    %c0_15 = arith.constant 0 : index
    %c0_16 = arith.constant 0 : index
    %c0_17 = arith.constant 0 : index
    %13 = vector.load %arg6[%c0_15, %c0_16, %c0_17] : memref<2x32x64xf32, #tpu.memory_space<vmem>>, vector<1x32x64xf32>
    %14 = vector.shape_cast %13 : vector<1x32x64xf32> to vector<32x64xf32>
    %c0_18 = arith.constant 0 : index
    %c0_19 = arith.constant 0 : index
    %c0_20 = arith.constant 0 : index
    %15 = vector.load %arg7[%c0_18, %c0_19, %c0_20] : memref<2x1x64xf32, #tpu.memory_space<vmem>>, vector<1x1x64xf32>
    %16 = vector.shape_cast %15 : vector<1x1x64xf32> to vector<1x64xf32>
    %c0_21 = arith.constant 0 : index
    %c0_22 = arith.constant 0 : index
    %c0_23 = arith.constant 0 : index
    %17 = vector.load %arg8[%c0_21, %c0_22, %c0_23] : memref<2x64x32xf32, #tpu.memory_space<vmem>>, vector<1x64x32xf32>
    %18 = vector.shape_cast %17 : vector<1x64x32xf32> to vector<64x32xf32>
    %c0_24 = arith.constant 0 : index
    %c0_25 = arith.constant 0 : index
    %c0_26 = arith.constant 0 : index
    %19 = vector.load %arg9[%c0_24, %c0_25, %c0_26] : memref<2x1x32xf32, #tpu.memory_space<vmem>>, vector<1x1x32xf32>
    %20 = vector.shape_cast %19 : vector<1x1x32xf32> to vector<1x32xf32>
    %c0_27 = arith.constant 0 : index
    %c0_28 = arith.constant 0 : index
    %c0_29 = arith.constant 0 : index
    %21 = vector.load %arg10[%c0_27, %c0_28, %c0_29] : memref<2x1x32xf32, #tpu.memory_space<vmem>>, vector<1x1x32xf32>
    %22 = vector.shape_cast %21 : vector<1x1x32xf32> to vector<1x32xf32>
    %c0_30 = arith.constant 0 : index
    %c0_31 = arith.constant 0 : index
    %c0_32 = arith.constant 0 : index
    %23 = vector.load %arg11[%c0_30, %c0_31, %c0_32] : memref<2x1x32xf32, #tpu.memory_space<vmem>>, vector<1x1x32xf32>
    %24 = vector.shape_cast %23 : vector<1x1x32xf32> to vector<1x32xf32>
    %c0_33 = arith.constant 0 : index
    %c0_34 = arith.constant 0 : index
    %c0_35 = arith.constant 0 : index
    %25 = vector.load %arg12[%c0_33, %c0_34, %c0_35] : memref<2x1x32xf32, #tpu.memory_space<vmem>>, vector<1x1x32xf32>
    %26 = vector.shape_cast %25 : vector<1x1x32xf32> to vector<1x32xf32>
    %c0_36 = arith.constant 0 : index
    %c0_37 = arith.constant 0 : index
    %c0_38 = arith.constant 0 : index
    %27 = vector.load %arg13[%c0_36, %c0_37, %c0_38] : memref<2x1x32xf32, #tpu.memory_space<vmem>>, vector<1x1x32xf32>
    %28 = vector.shape_cast %27 : vector<1x1x32xf32> to vector<1x32xf32>
    %cst_39 = arith.constant dense<0.000000e+00> : vector<16x96xf32>
    %29 = tpu.matmul %4, %6, %cst_39 {dimension_numbers = #tpu.dot_dimension_numbers<[1], [0], [0], [1], [0, 0, 1, 1], [], []>} : vector<16x32xf32>, vector<32x96xf32>, vector<16x96xf32> -> vector<16x96xf32>
    %30 = vector.broadcast %8 : vector<1x96xf32> to vector<16x96xf32>
    %31 = arith.addf %29, %30 : vector<16x96xf32>
    %32 = vector.shape_cast %31 : vector<16x96xf32> to vector<2x8x96xf32>
    %33 = vector.extract_strided_slice %32 {offsets = [0, 0, 0], sizes = [2, 8, 8], strides = [1, 1, 1]} : vector<2x8x96xf32> to vector<2x8x8xf32>
    %34 = vector.extract_strided_slice %32 {offsets = [0, 0, 32], sizes = [2, 8, 8], strides = [1, 1, 1]} : vector<2x8x96xf32> to vector<2x8x8xf32>
    %35 = vector.extract_strided_slice %32 {offsets = [0, 0, 64], sizes = [2, 8, 8], strides = [1, 1, 1]} : vector<2x8x96xf32> to vector<2x8x8xf32>
    "tpu.trace_start"() <{level = 10 : i32, message = "bqd,bkd->bqk"}> : () -> ()
    %cst_40 = arith.constant dense<0.000000e+00> : vector<2x8x8xf32>
    %36 = tpu.matmul %33, %34, %cst_40 {dimension_numbers = #tpu.dot_dimension_numbers<[2], [2], [1], [1], [0, 0, 0, 1, 1, 1], [0], [0]>} : vector<2x8x8xf32>, vector<2x8x8xf32>, vector<2x8x8xf32> -> vector<2x8x8xf32>
    "tpu.trace_stop"() : () -> ()
    %cst_41 = arith.constant 0.353553385 : f32
    %37 = vector.broadcast %cst_41 : f32 to vector<2x8x8xf32>
    %38 = arith.mulf %36, %37 : vector<2x8x8xf32>
    %cst_42 = arith.constant dense<0xFF800000> : vector<2x8xf32>
    %39 = vector.multi_reduction <maximumf>, %38, %cst_42 [2] : vector<2x8x8xf32> to vector<2x8xf32>
    %40 = vector.shape_cast %39 : vector<2x8xf32> to vector<2x8x1xf32>
    %41 = vector.broadcast %40 : vector<2x8x1xf32> to vector<2x8x8xf32>
    %42 = arith.subf %38, %41 : vector<2x8x8xf32>
    %43 = math.exp %42 : vector<2x8x8xf32>
    %cst_43 = arith.constant dense<0.000000e+00> : vector<2x8xf32>
    %44 = vector.multi_reduction <add>, %43, %cst_43 [2] : vector<2x8x8xf32> to vector<2x8xf32>
    %45 = vector.shape_cast %44 : vector<2x8xf32> to vector<2x8x1xf32>
    %46 = vector.broadcast %45 : vector<2x8x1xf32> to vector<2x8x8xf32>
    %47 = arith.divf %43, %46 : vector<2x8x8xf32>
    "tpu.trace_start"() <{level = 10 : i32, message = "bqk,bkd->bqd"}> : () -> ()
    %cst_44 = arith.constant dense<0.000000e+00> : vector<2x8x8xf32>
    %48 = tpu.matmul %47, %35, %cst_44 {dimension_numbers = #tpu.dot_dimension_numbers<[2], [1], [1], [2], [0, 0, 0, 1, 1, 2], [0], [0]>} : vector<2x8x8xf32>, vector<2x8x8xf32>, vector<2x8x8xf32> -> vector<2x8x8xf32>
    "tpu.trace_stop"() : () -> ()
    %49 = vector.extract_strided_slice %32 {offsets = [0, 0, 8], sizes = [2, 8, 8], strides = [1, 1, 1]} : vector<2x8x96xf32> to vector<2x8x8xf32>
    %50 = vector.extract_strided_slice %32 {offsets = [0, 0, 40], sizes = [2, 8, 8], strides = [1, 1, 1]} : vector<2x8x96xf32> to vector<2x8x8xf32>
    %51 = vector.extract_strided_slice %32 {offsets = [0, 0, 72], sizes = [2, 8, 8], strides = [1, 1, 1]} : vector<2x8x96xf32> to vector<2x8x8xf32>
    "tpu.trace_start"() <{level = 10 : i32, message = "bqd,bkd->bqk"}> : () -> ()
    %cst_45 = arith.constant dense<0.000000e+00> : vector<2x8x8xf32>
    %52 = tpu.matmul %49, %50, %cst_45 {dimension_numbers = #tpu.dot_dimension_numbers<[2], [2], [1], [1], [0, 0, 0, 1, 1, 1], [0], [0]>} : vector<2x8x8xf32>, vector<2x8x8xf32>, vector<2x8x8xf32> -> vector<2x8x8xf32>
    "tpu.trace_stop"() : () -> ()
    %cst_46 = arith.constant 0.353553385 : f32
    %53 = vector.broadcast %cst_46 : f32 to vector<2x8x8xf32>
    %54 = arith.mulf %52, %53 : vector<2x8x8xf32>
    %cst_47 = arith.constant dense<0xFF800000> : vector<2x8xf32>
    %55 = vector.multi_reduction <maximumf>, %54, %cst_47 [2] : vector<2x8x8xf32> to vector<2x8xf32>
    %56 = vector.shape_cast %55 : vector<2x8xf32> to vector<2x8x1xf32>
    %57 = vector.broadcast %56 : vector<2x8x1xf32> to vector<2x8x8xf32>
    %58 = arith.subf %54, %57 : vector<2x8x8xf32>
    %59 = math.exp %58 : vector<2x8x8xf32>
    %cst_48 = arith.constant dense<0.000000e+00> : vector<2x8xf32>
    %60 = vector.multi_reduction <add>, %59, %cst_48 [2] : vector<2x8x8xf32> to vector<2x8xf32>
    %61 = vector.shape_cast %60 : vector<2x8xf32> to vector<2x8x1xf32>
    %62 = vector.broadcast %61 : vector<2x8x1xf32> to vector<2x8x8xf32>
    %63 = arith.divf %59, %62 : vector<2x8x8xf32>
    "tpu.trace_start"() <{level = 10 : i32, message = "bqk,bkd->bqd"}> : () -> ()
    %cst_49 = arith.constant dense<0.000000e+00> : vector<2x8x8xf32>
    %64 = tpu.matmul %63, %51, %cst_49 {dimension_numbers = #tpu.dot_dimension_numbers<[2], [1], [1], [2], [0, 0, 0, 1, 1, 2], [0], [0]>} : vector<2x8x8xf32>, vector<2x8x8xf32>, vector<2x8x8xf32> -> vector<2x8x8xf32>
    "tpu.trace_stop"() : () -> ()
    %65 = vector.extract_strided_slice %32 {offsets = [0, 0, 16], sizes = [2, 8, 8], strides = [1, 1, 1]} : vector<2x8x96xf32> to vector<2x8x8xf32>
    %66 = vector.extract_strided_slice %32 {offsets = [0, 0, 48], sizes = [2, 8, 8], strides = [1, 1, 1]} : vector<2x8x96xf32> to vector<2x8x8xf32>
    %67 = vector.extract_strided_slice %32 {offsets = [0, 0, 80], sizes = [2, 8, 8], strides = [1, 1, 1]} : vector<2x8x96xf32> to vector<2x8x8xf32>
    "tpu.trace_start"() <{level = 10 : i32, message = "bqd,bkd->bqk"}> : () -> ()
    %cst_50 = arith.constant dense<0.000000e+00> : vector<2x8x8xf32>
    %68 = tpu.matmul %65, %66, %cst_50 {dimension_numbers = #tpu.dot_dimension_numbers<[2], [2], [1], [1], [0, 0, 0, 1, 1, 1], [0], [0]>} : vector<2x8x8xf32>, vector<2x8x8xf32>, vector<2x8x8xf32> -> vector<2x8x8xf32>
    "tpu.trace_stop"() : () -> ()
    %cst_51 = arith.constant 0.353553385 : f32
    %69 = vector.broadcast %cst_51 : f32 to vector<2x8x8xf32>
    %70 = arith.mulf %68, %69 : vector<2x8x8xf32>
    %cst_52 = arith.constant dense<0xFF800000> : vector<2x8xf32>
    %71 = vector.multi_reduction <maximumf>, %70, %cst_52 [2] : vector<2x8x8xf32> to vector<2x8xf32>
    %72 = vector.shape_cast %71 : vector<2x8xf32> to vector<2x8x1xf32>
    %73 = vector.broadcast %72 : vector<2x8x1xf32> to vector<2x8x8xf32>
    %74 = arith.subf %70, %73 : vector<2x8x8xf32>
    %75 = math.exp %74 : vector<2x8x8xf32>
    %cst_53 = arith.constant dense<0.000000e+00> : vector<2x8xf32>
    %76 = vector.multi_reduction <add>, %75, %cst_53 [2] : vector<2x8x8xf32> to vector<2x8xf32>
    %77 = vector.shape_cast %76 : vector<2x8xf32> to vector<2x8x1xf32>
    %78 = vector.broadcast %77 : vector<2x8x1xf32> to vector<2x8x8xf32>
    %79 = arith.divf %75, %78 : vector<2x8x8xf32>
    "tpu.trace_start"() <{level = 10 : i32, message = "bqk,bkd->bqd"}> : () -> ()
    %cst_54 = arith.constant dense<0.000000e+00> : vector<2x8x8xf32>
    %80 = tpu.matmul %79, %67, %cst_54 {dimension_numbers = #tpu.dot_dimension_numbers<[2], [1], [1], [2], [0, 0, 0, 1, 1, 2], [0], [0]>} : vector<2x8x8xf32>, vector<2x8x8xf32>, vector<2x8x8xf32> -> vector<2x8x8xf32>
    "tpu.trace_stop"() : () -> ()
    %81 = vector.extract_strided_slice %32 {offsets = [0, 0, 24], sizes = [2, 8, 8], strides = [1, 1, 1]} : vector<2x8x96xf32> to vector<2x8x8xf32>
    %82 = vector.extract_strided_slice %32 {offsets = [0, 0, 56], sizes = [2, 8, 8], strides = [1, 1, 1]} : vector<2x8x96xf32> to vector<2x8x8xf32>
    %83 = vector.extract_strided_slice %32 {offsets = [0, 0, 88], sizes = [2, 8, 8], strides = [1, 1, 1]} : vector<2x8x96xf32> to vector<2x8x8xf32>
    "tpu.trace_start"() <{level = 10 : i32, message = "bqd,bkd->bqk"}> : () -> ()
    %cst_55 = arith.constant dense<0.000000e+00> : vector<2x8x8xf32>
    %84 = tpu.matmul %81, %82, %cst_55 {dimension_numbers = #tpu.dot_dimension_numbers<[2], [2], [1], [1], [0, 0, 0, 1, 1, 1], [0], [0]>} : vector<2x8x8xf32>, vector<2x8x8xf32>, vector<2x8x8xf32> -> vector<2x8x8xf32>
    "tpu.trace_stop"() : () -> ()
    %cst_56 = arith.constant 0.353553385 : f32
    %85 = vector.broadcast %cst_56 : f32 to vector<2x8x8xf32>
    %86 = arith.mulf %84, %85 : vector<2x8x8xf32>
    %cst_57 = arith.constant dense<0xFF800000> : vector<2x8xf32>
    %87 = vector.multi_reduction <maximumf>, %86, %cst_57 [2] : vector<2x8x8xf32> to vector<2x8xf32>
    %88 = vector.shape_cast %87 : vector<2x8xf32> to vector<2x8x1xf32>
    %89 = vector.broadcast %88 : vector<2x8x1xf32> to vector<2x8x8xf32>
    %90 = arith.subf %86, %89 : vector<2x8x8xf32>
    %91 = math.exp %90 : vector<2x8x8xf32>
    %cst_58 = arith.constant dense<0.000000e+00> : vector<2x8xf32>
    %92 = vector.multi_reduction <add>, %91, %cst_58 [2] : vector<2x8x8xf32> to vector<2x8xf32>
    %93 = vector.shape_cast %92 : vector<2x8xf32> to vector<2x8x1xf32>
    %94 = vector.broadcast %93 : vector<2x8x1xf32> to vector<2x8x8xf32>
    %95 = arith.divf %91, %94 : vector<2x8x8xf32>
    "tpu.trace_start"() <{level = 10 : i32, message = "bqk,bkd->bqd"}> : () -> ()
    %cst_59 = arith.constant dense<0.000000e+00> : vector<2x8x8xf32>
    %96 = tpu.matmul %95, %83, %cst_59 {dimension_numbers = #tpu.dot_dimension_numbers<[2], [1], [1], [2], [0, 0, 0, 1, 1, 2], [0], [0]>} : vector<2x8x8xf32>, vector<2x8x8xf32>, vector<2x8x8xf32> -> vector<2x8x8xf32>
    "tpu.trace_stop"() : () -> ()
    %97 = tpu.concatenate %48, %64, %80, %96 in 2 : vector<2x8x8xf32>, vector<2x8x8xf32>, vector<2x8x8xf32>, vector<2x8x8xf32> -> vector<2x8x32xf32>
    %98 = vector.shape_cast %97 : vector<2x8x32xf32> to vector<16x32xf32>
    %cst_60 = arith.constant dense<0.000000e+00> : vector<16x32xf32>
    %99 = tpu.matmul %98, %10, %cst_60 {dimension_numbers = #tpu.dot_dimension_numbers<[1], [0], [0], [1], [0, 0, 1, 1], [], []>} : vector<16x32xf32>, vector<32x32xf32>, vector<16x32xf32> -> vector<16x32xf32>
    %100 = vector.broadcast %12 : vector<1x32xf32> to vector<16x32xf32>
    %101 = arith.addf %99, %100 : vector<16x32xf32>
    %102 = arith.addf %4, %101 : vector<16x32xf32>
    %cst_61 = arith.constant dense<0.000000e+00> : vector<16xf32>
    %103 = vector.multi_reduction <add>, %102, %cst_61 [1] : vector<16x32xf32> to vector<16xf32>
    %104 = vector.shape_cast %103 : vector<16xf32> to vector<16x1xf32>
    %cst_62 = arith.constant 3.200000e+01 : f32
    %105 = vector.broadcast %cst_62 : f32 to vector<16x1xf32>
    %106 = arith.divf %104, %105 : vector<16x1xf32>
    %107 = vector.broadcast %106 : vector<16x1xf32> to vector<16x32xf32>
    %108 = arith.subf %102, %107 : vector<16x32xf32>
    %109 = arith.mulf %108, %108 : vector<16x32xf32>
    %cst_63 = arith.constant dense<0.000000e+00> : vector<16xf32>
    %110 = vector.multi_reduction <add>, %109, %cst_63 [1] : vector<16x32xf32> to vector<16xf32>
    %111 = vector.shape_cast %110 : vector<16xf32> to vector<16x1xf32>
    %cst_64 = arith.constant 3.200000e+01 : f32
    %112 = vector.broadcast %cst_64 : f32 to vector<16x1xf32>
    %113 = arith.divf %111, %112 : vector<16x1xf32>
    %114 = vector.broadcast %106 : vector<16x1xf32> to vector<16x32xf32>
    %115 = arith.subf %102, %114 : vector<16x32xf32>
    %cst_65 = arith.constant 9.99999974E-6 : f32
    %116 = vector.broadcast %cst_65 : f32 to vector<16x1xf32>
    %117 = arith.addf %113, %116 : vector<16x1xf32>
    %118 = math.rsqrt %117 : vector<16x1xf32>
    %119 = vector.broadcast %118 : vector<16x1xf32> to vector<16x32xf32>
    %120 = arith.mulf %115, %119 : vector<16x32xf32>
    %121 = vector.broadcast %22 : vector<1x32xf32> to vector<16x32xf32>
    %122 = arith.mulf %120, %121 : vector<16x32xf32>
    %123 = vector.broadcast %24 : vector<1x32xf32> to vector<16x32xf32>
    %124 = arith.addf %122, %123 : vector<16x32xf32>
    %cst_66 = arith.constant dense<0.000000e+00> : vector<16x64xf32>
    %125 = tpu.matmul %124, %14, %cst_66 {dimension_numbers = #tpu.dot_dimension_numbers<[1], [0], [0], [1], [0, 0, 1, 1], [], []>} : vector<16x32xf32>, vector<32x64xf32>, vector<16x64xf32> -> vector<16x64xf32>
    %126 = vector.broadcast %16 : vector<1x64xf32> to vector<16x64xf32>
    %127 = arith.addf %125, %126 : vector<16x64xf32>
    %cst_67 = arith.constant 0.000000e+00 : f32
    %128 = vector.broadcast %cst_67 : f32 to vector<16x64xf32>
    %129 = arith.maximumf %127, %128 : vector<16x64xf32>
    %cst_68 = arith.constant dense<0.000000e+00> : vector<16x32xf32>
    %130 = tpu.matmul %129, %18, %cst_68 {dimension_numbers = #tpu.dot_dimension_numbers<[1], [0], [0], [1], [0, 0, 1, 1], [], []>} : vector<16x64xf32>, vector<64x32xf32>, vector<16x32xf32> -> vector<16x32xf32>
    %131 = vector.broadcast %20 : vector<1x32xf32> to vector<16x32xf32>
    %132 = arith.addf %130, %131 : vector<16x32xf32>
    %133 = arith.addf %124, %132 : vector<16x32xf32>
    %cst_69 = arith.constant dense<0.000000e+00> : vector<16xf32>
    %134 = vector.multi_reduction <add>, %133, %cst_69 [1] : vector<16x32xf32> to vector<16xf32>
    %135 = vector.shape_cast %134 : vector<16xf32> to vector<16x1xf32>
    %cst_70 = arith.constant 3.200000e+01 : f32
    %136 = vector.broadcast %cst_70 : f32 to vector<16x1xf32>
    %137 = arith.divf %135, %136 : vector<16x1xf32>
    %138 = vector.broadcast %137 : vector<16x1xf32> to vector<16x32xf32>
    %139 = arith.subf %133, %138 : vector<16x32xf32>
    %140 = arith.mulf %139, %139 : vector<16x32xf32>
    %cst_71 = arith.constant dense<0.000000e+00> : vector<16xf32>
    %141 = vector.multi_reduction <add>, %140, %cst_71 [1] : vector<16x32xf32> to vector<16xf32>
    %142 = vector.shape_cast %141 : vector<16xf32> to vector<16x1xf32>
    %cst_72 = arith.constant 3.200000e+01 : f32
    %143 = vector.broadcast %cst_72 : f32 to vector<16x1xf32>
    %144 = arith.divf %142, %143 : vector<16x1xf32>
    %145 = vector.broadcast %137 : vector<16x1xf32> to vector<16x32xf32>
    %146 = arith.subf %133, %145 : vector<16x32xf32>
    %cst_73 = arith.constant 9.99999974E-6 : f32
    %147 = vector.broadcast %cst_73 : f32 to vector<16x1xf32>
    %148 = arith.addf %144, %147 : vector<16x1xf32>
    %149 = math.rsqrt %148 : vector<16x1xf32>
    %150 = vector.broadcast %149 : vector<16x1xf32> to vector<16x32xf32>
    %151 = arith.mulf %146, %150 : vector<16x32xf32>
    %152 = vector.broadcast %26 : vector<1x32xf32> to vector<16x32xf32>
    %153 = arith.mulf %151, %152 : vector<16x32xf32>
    %154 = vector.broadcast %28 : vector<1x32xf32> to vector<16x32xf32>
    %155 = arith.addf %153, %154 : vector<16x32xf32>
    %c1 = arith.constant 1 : index
    %c0_74 = arith.constant 0 : index
    %c0_75 = arith.constant 0 : index
    %156 = vector.load %arg2[%c1, %c0_74, %c0_75] : memref<2x32x96xf32, #tpu.memory_space<vmem>>, vector<1x32x96xf32>
    %157 = vector.shape_cast %156 : vector<1x32x96xf32> to vector<32x96xf32>
    %c1_76 = arith.constant 1 : index
    %c0_77 = arith.constant 0 : index
    %c0_78 = arith.constant 0 : index
    %158 = vector.load %arg3[%c1_76, %c0_77, %c0_78] : memref<2x1x96xf32, #tpu.memory_space<vmem>>, vector<1x1x96xf32>
    %159 = vector.shape_cast %158 : vector<1x1x96xf32> to vector<1x96xf32>
    %c1_79 = arith.constant 1 : index
    %c0_80 = arith.constant 0 : index
    %c0_81 = arith.constant 0 : index
    %160 = vector.load %arg4[%c1_79, %c0_80, %c0_81] : memref<2x32x32xf32, #tpu.memory_space<vmem>>, vector<1x32x32xf32>
    %161 = vector.shape_cast %160 : vector<1x32x32xf32> to vector<32x32xf32>
    %c1_82 = arith.constant 1 : index
    %c0_83 = arith.constant 0 : index
    %c0_84 = arith.constant 0 : index
    %162 = vector.load %arg5[%c1_82, %c0_83, %c0_84] : memref<2x1x32xf32, #tpu.memory_space<vmem>>, vector<1x1x32xf32>
    %163 = vector.shape_cast %162 : vector<1x1x32xf32> to vector<1x32xf32>
    %c1_85 = arith.constant 1 : index
    %c0_86 = arith.constant 0 : index
    %c0_87 = arith.constant 0 : index
    %164 = vector.load %arg6[%c1_85, %c0_86, %c0_87] : memref<2x32x64xf32, #tpu.memory_space<vmem>>, vector<1x32x64xf32>
    %165 = vector.shape_cast %164 : vector<1x32x64xf32> to vector<32x64xf32>
    %c1_88 = arith.constant 1 : index
    %c0_89 = arith.constant 0 : index
    %c0_90 = arith.constant 0 : index
    %166 = vector.load %arg7[%c1_88, %c0_89, %c0_90] : memref<2x1x64xf32, #tpu.memory_space<vmem>>, vector<1x1x64xf32>
    %167 = vector.shape_cast %166 : vector<1x1x64xf32> to vector<1x64xf32>
    %c1_91 = arith.constant 1 : index
    %c0_92 = arith.constant 0 : index
    %c0_93 = arith.constant 0 : index
    %168 = vector.load %arg8[%c1_91, %c0_92, %c0_93] : memref<2x64x32xf32, #tpu.memory_space<vmem>>, vector<1x64x32xf32>
    %169 = vector.shape_cast %168 : vector<1x64x32xf32> to vector<64x32xf32>
    %c1_94 = arith.constant 1 : index
    %c0_95 = arith.constant 0 : index
    %c0_96 = arith.constant 0 : index
    %170 = vector.load %arg9[%c1_94, %c0_95, %c0_96] : memref<2x1x32xf32, #tpu.memory_space<vmem>>, vector<1x1x32xf32>
    %171 = vector.shape_cast %170 : vector<1x1x32xf32> to vector<1x32xf32>
    %c1_97 = arith.constant 1 : index
    %c0_98 = arith.constant 0 : index
    %c0_99 = arith.constant 0 : index
    %172 = vector.load %arg10[%c1_97, %c0_98, %c0_99] : memref<2x1x32xf32, #tpu.memory_space<vmem>>, vector<1x1x32xf32>
    %173 = vector.shape_cast %172 : vector<1x1x32xf32> to vector<1x32xf32>
    %c1_100 = arith.constant 1 : index
    %c0_101 = arith.constant 0 : index
    %c0_102 = arith.constant 0 : index
    %174 = vector.load %arg11[%c1_100, %c0_101, %c0_102] : memref<2x1x32xf32, #tpu.memory_space<vmem>>, vector<1x1x32xf32>
    %175 = vector.shape_cast %174 : vector<1x1x32xf32> to vector<1x32xf32>
    %c1_103 = arith.constant 1 : index
    %c0_104 = arith.constant 0 : index
    %c0_105 = arith.constant 0 : index
    %176 = vector.load %arg12[%c1_103, %c0_104, %c0_105] : memref<2x1x32xf32, #tpu.memory_space<vmem>>, vector<1x1x32xf32>
    %177 = vector.shape_cast %176 : vector<1x1x32xf32> to vector<1x32xf32>
    %c1_106 = arith.constant 1 : index
    %c0_107 = arith.constant 0 : index
    %c0_108 = arith.constant 0 : index
    %178 = vector.load %arg13[%c1_106, %c0_107, %c0_108] : memref<2x1x32xf32, #tpu.memory_space<vmem>>, vector<1x1x32xf32>
    %179 = vector.shape_cast %178 : vector<1x1x32xf32> to vector<1x32xf32>
    %cst_109 = arith.constant dense<0.000000e+00> : vector<16x96xf32>
    %180 = tpu.matmul %155, %157, %cst_109 {dimension_numbers = #tpu.dot_dimension_numbers<[1], [0], [0], [1], [0, 0, 1, 1], [], []>} : vector<16x32xf32>, vector<32x96xf32>, vector<16x96xf32> -> vector<16x96xf32>
    %181 = vector.broadcast %159 : vector<1x96xf32> to vector<16x96xf32>
    %182 = arith.addf %180, %181 : vector<16x96xf32>
    %183 = vector.shape_cast %182 : vector<16x96xf32> to vector<2x8x96xf32>
    %184 = vector.extract_strided_slice %183 {offsets = [0, 0, 0], sizes = [2, 8, 8], strides = [1, 1, 1]} : vector<2x8x96xf32> to vector<2x8x8xf32>
    %185 = vector.extract_strided_slice %183 {offsets = [0, 0, 32], sizes = [2, 8, 8], strides = [1, 1, 1]} : vector<2x8x96xf32> to vector<2x8x8xf32>
    %186 = vector.extract_strided_slice %183 {offsets = [0, 0, 64], sizes = [2, 8, 8], strides = [1, 1, 1]} : vector<2x8x96xf32> to vector<2x8x8xf32>
    "tpu.trace_start"() <{level = 10 : i32, message = "bqd,bkd->bqk"}> : () -> ()
    %cst_110 = arith.constant dense<0.000000e+00> : vector<2x8x8xf32>
    %187 = tpu.matmul %184, %185, %cst_110 {dimension_numbers = #tpu.dot_dimension_numbers<[2], [2], [1], [1], [0, 0, 0, 1, 1, 1], [0], [0]>} : vector<2x8x8xf32>, vector<2x8x8xf32>, vector<2x8x8xf32> -> vector<2x8x8xf32>
    "tpu.trace_stop"() : () -> ()
    %cst_111 = arith.constant 0.353553385 : f32
    %188 = vector.broadcast %cst_111 : f32 to vector<2x8x8xf32>
    %189 = arith.mulf %187, %188 : vector<2x8x8xf32>
    %cst_112 = arith.constant dense<0xFF800000> : vector<2x8xf32>
    %190 = vector.multi_reduction <maximumf>, %189, %cst_112 [2] : vector<2x8x8xf32> to vector<2x8xf32>
    %191 = vector.shape_cast %190 : vector<2x8xf32> to vector<2x8x1xf32>
    %192 = vector.broadcast %191 : vector<2x8x1xf32> to vector<2x8x8xf32>
    %193 = arith.subf %189, %192 : vector<2x8x8xf32>
    %194 = math.exp %193 : vector<2x8x8xf32>
    %cst_113 = arith.constant dense<0.000000e+00> : vector<2x8xf32>
    %195 = vector.multi_reduction <add>, %194, %cst_113 [2] : vector<2x8x8xf32> to vector<2x8xf32>
    %196 = vector.shape_cast %195 : vector<2x8xf32> to vector<2x8x1xf32>
    %197 = vector.broadcast %196 : vector<2x8x1xf32> to vector<2x8x8xf32>
    %198 = arith.divf %194, %197 : vector<2x8x8xf32>
    "tpu.trace_start"() <{level = 10 : i32, message = "bqk,bkd->bqd"}> : () -> ()
    %cst_114 = arith.constant dense<0.000000e+00> : vector<2x8x8xf32>
    %199 = tpu.matmul %198, %186, %cst_114 {dimension_numbers = #tpu.dot_dimension_numbers<[2], [1], [1], [2], [0, 0, 0, 1, 1, 2], [0], [0]>} : vector<2x8x8xf32>, vector<2x8x8xf32>, vector<2x8x8xf32> -> vector<2x8x8xf32>
    "tpu.trace_stop"() : () -> ()
    %200 = vector.extract_strided_slice %183 {offsets = [0, 0, 8], sizes = [2, 8, 8], strides = [1, 1, 1]} : vector<2x8x96xf32> to vector<2x8x8xf32>
    %201 = vector.extract_strided_slice %183 {offsets = [0, 0, 40], sizes = [2, 8, 8], strides = [1, 1, 1]} : vector<2x8x96xf32> to vector<2x8x8xf32>
    %202 = vector.extract_strided_slice %183 {offsets = [0, 0, 72], sizes = [2, 8, 8], strides = [1, 1, 1]} : vector<2x8x96xf32> to vector<2x8x8xf32>
    "tpu.trace_start"() <{level = 10 : i32, message = "bqd,bkd->bqk"}> : () -> ()
    %cst_115 = arith.constant dense<0.000000e+00> : vector<2x8x8xf32>
    %203 = tpu.matmul %200, %201, %cst_115 {dimension_numbers = #tpu.dot_dimension_numbers<[2], [2], [1], [1], [0, 0, 0, 1, 1, 1], [0], [0]>} : vector<2x8x8xf32>, vector<2x8x8xf32>, vector<2x8x8xf32> -> vector<2x8x8xf32>
    "tpu.trace_stop"() : () -> ()
    %cst_116 = arith.constant 0.353553385 : f32
    %204 = vector.broadcast %cst_116 : f32 to vector<2x8x8xf32>
    %205 = arith.mulf %203, %204 : vector<2x8x8xf32>
    %cst_117 = arith.constant dense<0xFF800000> : vector<2x8xf32>
    %206 = vector.multi_reduction <maximumf>, %205, %cst_117 [2] : vector<2x8x8xf32> to vector<2x8xf32>
    %207 = vector.shape_cast %206 : vector<2x8xf32> to vector<2x8x1xf32>
    %208 = vector.broadcast %207 : vector<2x8x1xf32> to vector<2x8x8xf32>
    %209 = arith.subf %205, %208 : vector<2x8x8xf32>
    %210 = math.exp %209 : vector<2x8x8xf32>
    %cst_118 = arith.constant dense<0.000000e+00> : vector<2x8xf32>
    %211 = vector.multi_reduction <add>, %210, %cst_118 [2] : vector<2x8x8xf32> to vector<2x8xf32>
    %212 = vector.shape_cast %211 : vector<2x8xf32> to vector<2x8x1xf32>
    %213 = vector.broadcast %212 : vector<2x8x1xf32> to vector<2x8x8xf32>
    %214 = arith.divf %210, %213 : vector<2x8x8xf32>
    "tpu.trace_start"() <{level = 10 : i32, message = "bqk,bkd->bqd"}> : () -> ()
    %cst_119 = arith.constant dense<0.000000e+00> : vector<2x8x8xf32>
    %215 = tpu.matmul %214, %202, %cst_119 {dimension_numbers = #tpu.dot_dimension_numbers<[2], [1], [1], [2], [0, 0, 0, 1, 1, 2], [0], [0]>} : vector<2x8x8xf32>, vector<2x8x8xf32>, vector<2x8x8xf32> -> vector<2x8x8xf32>
    "tpu.trace_stop"() : () -> ()
    %216 = vector.extract_strided_slice %183 {offsets = [0, 0, 16], sizes = [2, 8, 8], strides = [1, 1, 1]} : vector<2x8x96xf32> to vector<2x8x8xf32>
    %217 = vector.extract_strided_slice %183 {offsets = [0, 0, 48], sizes = [2, 8, 8], strides = [1, 1, 1]} : vector<2x8x96xf32> to vector<2x8x8xf32>
    %218 = vector.extract_strided_slice %183 {offsets = [0, 0, 80], sizes = [2, 8, 8], strides = [1, 1, 1]} : vector<2x8x96xf32> to vector<2x8x8xf32>
    "tpu.trace_start"() <{level = 10 : i32, message = "bqd,bkd->bqk"}> : () -> ()
    %cst_120 = arith.constant dense<0.000000e+00> : vector<2x8x8xf32>
    %219 = tpu.matmul %216, %217, %cst_120 {dimension_numbers = #tpu.dot_dimension_numbers<[2], [2], [1], [1], [0, 0, 0, 1, 1, 1], [0], [0]>} : vector<2x8x8xf32>, vector<2x8x8xf32>, vector<2x8x8xf32> -> vector<2x8x8xf32>
    "tpu.trace_stop"() : () -> ()
    %cst_121 = arith.constant 0.353553385 : f32
    %220 = vector.broadcast %cst_121 : f32 to vector<2x8x8xf32>
    %221 = arith.mulf %219, %220 : vector<2x8x8xf32>
    %cst_122 = arith.constant dense<0xFF800000> : vector<2x8xf32>
    %222 = vector.multi_reduction <maximumf>, %221, %cst_122 [2] : vector<2x8x8xf32> to vector<2x8xf32>
    %223 = vector.shape_cast %222 : vector<2x8xf32> to vector<2x8x1xf32>
    %224 = vector.broadcast %223 : vector<2x8x1xf32> to vector<2x8x8xf32>
    %225 = arith.subf %221, %224 : vector<2x8x8xf32>
    %226 = math.exp %225 : vector<2x8x8xf32>
    %cst_123 = arith.constant dense<0.000000e+00> : vector<2x8xf32>
    %227 = vector.multi_reduction <add>, %226, %cst_123 [2] : vector<2x8x8xf32> to vector<2x8xf32>
    %228 = vector.shape_cast %227 : vector<2x8xf32> to vector<2x8x1xf32>
    %229 = vector.broadcast %228 : vector<2x8x1xf32> to vector<2x8x8xf32>
    %230 = arith.divf %226, %229 : vector<2x8x8xf32>
    "tpu.trace_start"() <{level = 10 : i32, message = "bqk,bkd->bqd"}> : () -> ()
    %cst_124 = arith.constant dense<0.000000e+00> : vector<2x8x8xf32>
    %231 = tpu.matmul %230, %218, %cst_124 {dimension_numbers = #tpu.dot_dimension_numbers<[2], [1], [1], [2], [0, 0, 0, 1, 1, 2], [0], [0]>} : vector<2x8x8xf32>, vector<2x8x8xf32>, vector<2x8x8xf32> -> vector<2x8x8xf32>
    "tpu.trace_stop"() : () -> ()
    %232 = vector.extract_strided_slice %183 {offsets = [0, 0, 24], sizes = [2, 8, 8], strides = [1, 1, 1]} : vector<2x8x96xf32> to vector<2x8x8xf32>
    %233 = vector.extract_strided_slice %183 {offsets = [0, 0, 56], sizes = [2, 8, 8], strides = [1, 1, 1]} : vector<2x8x96xf32> to vector<2x8x8xf32>
    %234 = vector.extract_strided_slice %183 {offsets = [0, 0, 88], sizes = [2, 8, 8], strides = [1, 1, 1]} : vector<2x8x96xf32> to vector<2x8x8xf32>
    "tpu.trace_start"() <{level = 10 : i32, message = "bqd,bkd->bqk"}> : () -> ()
    %cst_125 = arith.constant dense<0.000000e+00> : vector<2x8x8xf32>
    %235 = tpu.matmul %232, %233, %cst_125 {dimension_numbers = #tpu.dot_dimension_numbers<[2], [2], [1], [1], [0, 0, 0, 1, 1, 1], [0], [0]>} : vector<2x8x8xf32>, vector<2x8x8xf32>, vector<2x8x8xf32> -> vector<2x8x8xf32>
    "tpu.trace_stop"() : () -> ()
    %cst_126 = arith.constant 0.353553385 : f32
    %236 = vector.broadcast %cst_126 : f32 to vector<2x8x8xf32>
    %237 = arith.mulf %235, %236 : vector<2x8x8xf32>
    %cst_127 = arith.constant dense<0xFF800000> : vector<2x8xf32>
    %238 = vector.multi_reduction <maximumf>, %237, %cst_127 [2] : vector<2x8x8xf32> to vector<2x8xf32>
    %239 = vector.shape_cast %238 : vector<2x8xf32> to vector<2x8x1xf32>
    %240 = vector.broadcast %239 : vector<2x8x1xf32> to vector<2x8x8xf32>
    %241 = arith.subf %237, %240 : vector<2x8x8xf32>
    %242 = math.exp %241 : vector<2x8x8xf32>
    %cst_128 = arith.constant dense<0.000000e+00> : vector<2x8xf32>
    %243 = vector.multi_reduction <add>, %242, %cst_128 [2] : vector<2x8x8xf32> to vector<2x8xf32>
    %244 = vector.shape_cast %243 : vector<2x8xf32> to vector<2x8x1xf32>
    %245 = vector.broadcast %244 : vector<2x8x1xf32> to vector<2x8x8xf32>
    %246 = arith.divf %242, %245 : vector<2x8x8xf32>
    "tpu.trace_start"() <{level = 10 : i32, message = "bqk,bkd->bqd"}> : () -> ()
    %cst_129 = arith.constant dense<0.000000e+00> : vector<2x8x8xf32>
    %247 = tpu.matmul %246, %234, %cst_129 {dimension_numbers = #tpu.dot_dimension_numbers<[2], [1], [1], [2], [0, 0, 0, 1, 1, 2], [0], [0]>} : vector<2x8x8xf32>, vector<2x8x8xf32>, vector<2x8x8xf32> -> vector<2x8x8xf32>
    "tpu.trace_stop"() : () -> ()
    %248 = tpu.concatenate %199, %215, %231, %247 in 2 : vector<2x8x8xf32>, vector<2x8x8xf32>, vector<2x8x8xf32>, vector<2x8x8xf32> -> vector<2x8x32xf32>
    %249 = vector.shape_cast %248 : vector<2x8x32xf32> to vector<16x32xf32>
    %cst_130 = arith.constant dense<0.000000e+00> : vector<16x32xf32>
    %250 = tpu.matmul %249, %161, %cst_130 {dimension_numbers = #tpu.dot_dimension_numbers<[1], [0], [0], [1], [0, 0, 1, 1], [], []>} : vector<16x32xf32>, vector<32x32xf32>, vector<16x32xf32> -> vector<16x32xf32>
    %251 = vector.broadcast %163 : vector<1x32xf32> to vector<16x32xf32>
    %252 = arith.addf %250, %251 : vector<16x32xf32>
    %253 = arith.addf %155, %252 : vector<16x32xf32>
    %cst_131 = arith.constant dense<0.000000e+00> : vector<16xf32>
    %254 = vector.multi_reduction <add>, %253, %cst_131 [1] : vector<16x32xf32> to vector<16xf32>
    %255 = vector.shape_cast %254 : vector<16xf32> to vector<16x1xf32>
    %cst_132 = arith.constant 3.200000e+01 : f32
    %256 = vector.broadcast %cst_132 : f32 to vector<16x1xf32>
    %257 = arith.divf %255, %256 : vector<16x1xf32>
    %258 = vector.broadcast %257 : vector<16x1xf32> to vector<16x32xf32>
    %259 = arith.subf %253, %258 : vector<16x32xf32>
    %260 = arith.mulf %259, %259 : vector<16x32xf32>
    %cst_133 = arith.constant dense<0.000000e+00> : vector<16xf32>
    %261 = vector.multi_reduction <add>, %260, %cst_133 [1] : vector<16x32xf32> to vector<16xf32>
    %262 = vector.shape_cast %261 : vector<16xf32> to vector<16x1xf32>
    %cst_134 = arith.constant 3.200000e+01 : f32
    %263 = vector.broadcast %cst_134 : f32 to vector<16x1xf32>
    %264 = arith.divf %262, %263 : vector<16x1xf32>
    %265 = vector.broadcast %257 : vector<16x1xf32> to vector<16x32xf32>
    %266 = arith.subf %253, %265 : vector<16x32xf32>
    %cst_135 = arith.constant 9.99999974E-6 : f32
    %267 = vector.broadcast %cst_135 : f32 to vector<16x1xf32>
    %268 = arith.addf %264, %267 : vector<16x1xf32>
    %269 = math.rsqrt %268 : vector<16x1xf32>
    %270 = vector.broadcast %269 : vector<16x1xf32> to vector<16x32xf32>
    %271 = arith.mulf %266, %270 : vector<16x32xf32>
    %272 = vector.broadcast %173 : vector<1x32xf32> to vector<16x32xf32>
    %273 = arith.mulf %271, %272 : vector<16x32xf32>
    %274 = vector.broadcast %175 : vector<1x32xf32> to vector<16x32xf32>
    %275 = arith.addf %273, %274 : vector<16x32xf32>
    %cst_136 = arith.constant dense<0.000000e+00> : vector<16x64xf32>
    %276 = tpu.matmul %275, %165, %cst_136 {dimension_numbers = #tpu.dot_dimension_numbers<[1], [0], [0], [1], [0, 0, 1, 1], [], []>} : vector<16x32xf32>, vector<32x64xf32>, vector<16x64xf32> -> vector<16x64xf32>
    %277 = vector.broadcast %167 : vector<1x64xf32> to vector<16x64xf32>
    %278 = arith.addf %276, %277 : vector<16x64xf32>
    %cst_137 = arith.constant 0.000000e+00 : f32
    %279 = vector.broadcast %cst_137 : f32 to vector<16x64xf32>
    %280 = arith.maximumf %278, %279 : vector<16x64xf32>
    %cst_138 = arith.constant dense<0.000000e+00> : vector<16x32xf32>
    %281 = tpu.matmul %280, %169, %cst_138 {dimension_numbers = #tpu.dot_dimension_numbers<[1], [0], [0], [1], [0, 0, 1, 1], [], []>} : vector<16x64xf32>, vector<64x32xf32>, vector<16x32xf32> -> vector<16x32xf32>
    %282 = vector.broadcast %171 : vector<1x32xf32> to vector<16x32xf32>
    %283 = arith.addf %281, %282 : vector<16x32xf32>
    %284 = arith.addf %275, %283 : vector<16x32xf32>
    %cst_139 = arith.constant dense<0.000000e+00> : vector<16xf32>
    %285 = vector.multi_reduction <add>, %284, %cst_139 [1] : vector<16x32xf32> to vector<16xf32>
    %286 = vector.shape_cast %285 : vector<16xf32> to vector<16x1xf32>
    %cst_140 = arith.constant 3.200000e+01 : f32
    %287 = vector.broadcast %cst_140 : f32 to vector<16x1xf32>
    %288 = arith.divf %286, %287 : vector<16x1xf32>
    %289 = vector.broadcast %288 : vector<16x1xf32> to vector<16x32xf32>
    %290 = arith.subf %284, %289 : vector<16x32xf32>
    %291 = arith.mulf %290, %290 : vector<16x32xf32>
    %cst_141 = arith.constant dense<0.000000e+00> : vector<16xf32>
    %292 = vector.multi_reduction <add>, %291, %cst_141 [1] : vector<16x32xf32> to vector<16xf32>
    %293 = vector.shape_cast %292 : vector<16xf32> to vector<16x1xf32>
    %cst_142 = arith.constant 3.200000e+01 : f32
    %294 = vector.broadcast %cst_142 : f32 to vector<16x1xf32>
    %295 = arith.divf %293, %294 : vector<16x1xf32>
    %296 = vector.broadcast %288 : vector<16x1xf32> to vector<16x32xf32>
    %297 = arith.subf %284, %296 : vector<16x32xf32>
    %cst_143 = arith.constant 9.99999974E-6 : f32
    %298 = vector.broadcast %cst_143 : f32 to vector<16x1xf32>
    %299 = arith.addf %295, %298 : vector<16x1xf32>
    %300 = math.rsqrt %299 : vector<16x1xf32>
    %301 = vector.broadcast %300 : vector<16x1xf32> to vector<16x32xf32>
    %302 = arith.mulf %297, %301 : vector<16x32xf32>
    %303 = vector.broadcast %177 : vector<1x32xf32> to vector<16x32xf32>
    %304 = arith.mulf %302, %303 : vector<16x32xf32>
    %305 = vector.broadcast %179 : vector<1x32xf32> to vector<16x32xf32>
    %306 = arith.addf %304, %305 : vector<16x32xf32>
    %c0_144 = arith.constant 0 : index
    %c0_145 = arith.constant 0 : index
    %307 = vector.load %arg14[%c0_144, %c0_145] : memref<16x32xf32, #tpu.memory_space<vmem>>, vector<16x32xf32>
    tpu.vector_store %arg14[%c0_144, %c0_145], %306 {strides = array<i32>} : memref<16x32xf32, #tpu.memory_space<vmem>>, vector<16x32xf32>,
    return
  }
}

</mosaic_0001>

<bundles_post_ra>
// kernel: transformer_encoder.1
= control target key start
LH: loop header
LB: loop body
LE: loop exit
PB: predicated region body
PF: predicated region fallthrough
CT: control target
= control target key end

     0   :  { %vm89_vm0 = vcmask 261120   ;;  %v4391_v14 = vmov 0.0   ;;  %vm4392_vm1 = vmmov 0   ;;  %s4393_s29 = smov 96   ;;  %vm174_vm2 = vcmask 64512   ;;  %s4394_s30 = smov 64   ;;  %s5042_s2 = inlined_call_operand.vmem [shape: f32[2,32,96], index: 2, kind: input, shape index: {}]   ;;  %s5043_s0 = inlined_call_operand.vmem [shape: f32[16,32], index: 0, kind: input, shape index: {}]   ;;  %s5044_s1 = inlined_call_operand.vmem [shape: f32[16,32], index: 1, kind: input, shape index: {}]   ;;  %s5045_s3 = inlined_call_operand.vmem [shape: f32[2,1,96], index: 3, kind: input, shape index: {}]   ;;  %s5046_s4 = inlined_call_operand.vmem [shape: f32[2,32,32], index: 4, kind: input, shape index: {}]   ;;  %s5047_s5 = inlined_call_operand.vmem [shape: f32[2,1,32], index: 5, kind: input, shape index: {}]   ;;  %s5048_s6 = inlined_call_operand.vmem [shape: f32[2,32,64], index: 6, kind: input, shape index: {}]   ;;  %s5049_s8 = inlined_call_operand.vmem [shape: f32[2,64,32], index: 8, kind: input, shape index: {}]   ;;  %s5050_s10 = inlined_call_operand.vmem [shape: f32[2,1,32], index: 10, kind: input, shape index: {}]   ;;  %s5051_s11 = inlined_call_operand.vmem [shape: f32[2,1,32], index: 11, kind: input, shape index: {}]   ;;  %s5052_s7 = inlined_call_operand.vmem [shape: f32[2,1,64], index: 7, kind: input, shape index: {}]   ;;  %s5053_s9 = inlined_call_operand.vmem [shape: f32[2,1,32], index: 9, kind: input, shape index: {}]   ;;  %s5054_s12 = inlined_call_operand.vmem [shape: f32[2,1,32], index: 12, kind: input, shape index: {}]   ;;  %s5055_s13 = inlined_call_operand.vmem [shape: f32[2,1,32], index: 13, kind: input, shape index: {}]   ;;  %s5056_s14 = inlined_call_operand.vmem [shape: f32[16,32], index: 14, kind: output, shape index: {}]  }
   0x1   :  { %v55_v0 = vld [vmem:[%s5042_s2] sm:$0xff]  ;;  %v56_v1 = vld [vmem:[%s5042_s2 + $0x8] sm:$0xff]  ;;  %v57_v2 = vld [vmem:[%s5042_s2 + $0x10] sm:$0xff]  ;;  %3972 = vmatprep.subr.mxu0 %v4391_v14  ;;  %3974 = vmatprep.mubr.msk.f32.mxu0 %vm4392_vm1, %v4391_v14  ;;  %s4395_s15 = smov 88   ;;  %s4396_s16 = smov 120   ;;  %vm1527_vm3 = vcmask 195584  }
   0x2   :  { %v4215_v3 = vpack.c.bf16 %v56_v1, %v55_v0  ;;  %v58_v4 = vld [vmem:[%s5042_s2 + $0x18] sm:$0xff]  ;;  %v47_v5 = vld [vmem:[%s5043_s0] sm:$0xff]  ;;  %v48_v6 = vld [vmem:[%s5043_s0 + $0x8] sm:$0xff]  ;;  %s4397_s17 = smov 56   ;;  %s4398_s18 = smov 80   ;;  %vm1524_vm4 = vcmask 130048  }
   0x3   :  { %v4219_v7 = vpack.c.bf16 %v58_v4, %v57_v2  ;;  %v49_v8 = vmul.f32 5.656854, %v47_v5  ;;  %v51_v9 = vld [vmem:[%s5044_s1] sm:$0xff]  ;;  %v50_v10 = vmul.f32 5.656854, %v48_v6  ;;  %v52_v11 = vld [vmem:[%s5044_s1 + $0x8] sm:$0xff] }
   0x4   :  { %4216 = vmatprep.subr.bf16.mxu1 %v4215_v3  ;;  %v3723_v15 = vld [vmem:[%s5045_s3] ss:$0 sm:$0xff]  ;;  %s4399_s19 = smov 112   ;;  %s4400_s20 = smov 48   ;;  %vm1757_vm5 = vcmask 523264  }
   0x5   :  { %4218 = vmatpush3.bf16.msra.mxu1 %v4215_v3  ;;  %v4506_v12 = vadd.f32 %v51_v9, %v49_v8  ;;  %v4510_v13 = vadd.f32 %v52_v11, %v50_v10  ;;  %s5067_s21 = smov 72   ;;  %s5065_s22 = smov 104  }
   0x6   :  { %4220 = vmatprep.subr.bf16.mxu1 %v4219_v7  ;;  %s5061_s23 = smov 40   ;;  %s5059_s24 = smov 8  }
   0x7   :  { %3959 = vmatprep.mubr.msk.f32.mxu1 %vm89_vm0, %v4506_v12  ;;  %s5057_s25 = smov 16   ;;  %s5063_s26 = smov 24  }
   0x8   :  { %s5074_s27 = smov 24  }
   0x9   :  { %4222 = vmatpush3.bf16.msra.mxu1 %v4219_v7 }
   0xa   :  { %3962 = vmatprep.subr.mxu1 %v4391_v14 }
   0xc   :  { %3960 = vmatmul.mubr.msk.f32.vlgmr.msra.gmra.mrb[0].mxu1 %vm89_vm0, %v4510_v13 }
   0xd   :  { %3964 = vmatprep.mubr.msk.f32.mxu1 %vm4392_vm1, %v4391_v14 }
  0xdf   :  { %v3961_v16 = vpop.f32.mrb[0].mxu1 }
  0xe0   :  { %v162_v17 = vpop.f32.mrb[1].mxu1  ;;  %v4527_v19 = vadd.f32 %v3961_v16, %v3723_v15 }
  0xe1   :  { %v4523_v18 = vadd.f32 %v3723_v15, %v162_v17 }
  0xe3   :  { %172 = vrot.lane.b32.xlu0 %v4523_v18, %s4393_s29 }
  0xe7   :  { %250 = vrot.lane.b32.xlu0 %v4527_v19, %s4393_s29 }
 0x155   :  { %v173_v20 = vpop.permute.xlu0 %172 }
 0x156   :  { %3963 = vmatpush3.xpose.msk.msra.mxu1 %vm174_vm2, %v173_v20 }
 0x157   :  { %3967 = vmatprep.subr.mxu1 %v4391_v14 }
 0x159   :  { %3965 = vmatmul.mubr.msk.f32.vlgmr.msra.gmra.mrb[2].mxu1 %vm174_vm2, %v4523_v18  ;;  %v251_v21 = vpop.permute.xlu0 %250 }
 0x15a   :  { %3968 = vmatpush3.xpose.msk.msra.mxu1 %vm174_vm2, %v251_v21  ;;  %3969 = vmatprep.mubr.msk.f32.mxu1 %vm4392_vm1, %v4391_v14 }
 0x15b   :  { %3977 = vmatprep.subr.mxu1 %v4391_v14 }
 0x15d   :  { %3970 = vmatmul.mubr.msk.f32.vlgmr.msra.gmra.mrb[4].mxu1 %vm174_vm2, %v4527_v19 }
 0x15e   :  { %3979 = vmatprep.mubr.msk.f32.mxu1 %vm4392_vm1, %v4391_v14 }
 0x22c   :  { %v245_v22 = vpop.f32.mrb[2].mxu1 }
 0x22d   :  { %v326_v23 = vmul.f32 0.35355338, %v245_v22  ;;  %v3966_v24 = vpop.f32.mrb[3].mxu1 }
 0x22f   :  { %v328_v25 = vsel %vm174_vm2, %v326_v23, -inf }
 0x230   :  { %329 = vmax.xlane.f32.xlu1 %v328_v25  ;;  %v322_v26 = vpop.f32.mrb[4].mxu1 }
 0x231   :  { %v327_v27 = vmul.f32 0.35355338, %v322_v26  ;;  %v3971_v28 = vpop.f32.mrb[5].mxu1 }
 0x233   :  { %v331_v29 = vsel %vm174_vm2, %v327_v27, -inf }
 0x234   :  { %332 = vmax.xlane.f32.xlu1 %v331_v29 }
 0x245   :  { %350 = vrot.lane.b32.xlu1 %v4523_v18, %s4394_s30 }
 0x249   :  { %426 = vrot.lane.b32.xlu1 %v4527_v19, %s4394_s30 }
 0x24d   :  { %504 = vrot.lane.b32.xlu1 %v4523_v18, %s4395_s15 }
 0x251   :  { %582 = vrot.lane.b32.xlu1 %v4527_v19, %s4395_s15 }
 0x2bd   :  { %v330_v30 = vpop.xlane.xlu1 %329 }
 0x2be   :  { %v334_v31 = vsub.f32 %v326_v23, %v330_v30 }
 0x2c0   :  { %v336_v32 = vmul.f32 1.442695, %v334_v31 }
 0x2c1   :  { %v333_v33 = vpop.xlane.xlu1 %332 }
 0x2c2   :  { %4311 = vpow2.f32 %v336_v32  ;;  %v335_v34 = vsub.f32 %v327_v27, %v333_v33 }
 0x2c4   :  { %v338_v35 = vmul.f32 1.442695, %v335_v34 }
 0x2c5   :  { %v351_v36 = vpop.permute.xlu1 %350 }
 0x2c6   :  { %4313 = vpow2.f32 %v338_v35  ;;  %3973 = vmatpush3.msra.mxu0 %v351_v36 }
 0x2c7   :  { %3982 = vmatprep.subr.mxu0 %v4391_v14 }
 0x2c9   :  { %v427_v37 = vpop.permute.xlu1 %426 }
 0x2ca   :  { %3978 = vmatpush3.msra.mxu1 %v427_v37 }
 0x2cb   :  { %3987 = vmatprep.subr.mxu1 %v4391_v14 }
 0x2cc   :  { %v4312_v38 = vpop.eup %4311 }
 0x2cd   :  { %v340_v39 = vsel %vm174_vm2, %v4312_v38, 0.0  ;;  %v505_v42 = vpop.permute.xlu1 %504 }
 0x2ce   :  { %341 = vadd.xlane.f32.xlu0 %v340_v39 }
 0x2d0   :  { %v4314_v40 = vpop.eup %4313 }
 0x2d1   :  { %v343_v41 = vsel %vm174_vm2, %v4314_v40, 0.0  ;;  %v583_v43 = vpop.permute.xlu1 %582 }
 0x2d2   :  { %344 = vadd.xlane.f32.xlu1 %v343_v41 }
 0x2e3   :  { %580 = vrot.lane.b32.xlu1 %v4527_v19, %s4396_s16 }
 0x2e4   :  { %502 = vrot.lane.b32.xlu0 %v4523_v18, %s4396_s16 }
 0x35b   :  { %v342_v44 = vpop.xlane.xlu0 %341 }
 0x35c   :  { %4315 = vrcp.f32 %v342_v44 }
 0x35f   :  { %v345_v45 = vpop.xlane.xlu1 %344  ;;  %v503_v50 = vpop.permute.xlu0 %502 }
 0x360   :  { %4317 = vrcp.f32 %v345_v45 }
 0x363   :  { %v581_v51 = vpop.permute.xlu1 %580 }
 0x366   :  { %v4316_v46 = vpop.eup %4315 }
 0x367   :  { %v347_v47 = vmul.f32 %v4316_v46, %v4312_v38 }
 0x369   :  { %3975 = vmatmul.mubr.msk.f32.vlgmr.msra.gmra.mrb[0].mxu0 %vm174_vm2, %v347_v47 }
 0x36a   :  { %v4318_v48 = vpop.eup %4317  ;;  %3983 = vmatpush3.xpose.msk.msra.mxu0 %vm174_vm2, %v505_v42  ;;  %3984 = vmatprep.mubr.msk.f32.mxu0 %vm4392_vm1, %v4391_v14 }
 0x36b   :  { %v349_v49 = vmul.f32 %v4318_v48, %v4314_v40  ;;  %3992 = vmatprep.subr.mxu0 %v4391_v14 }
 0x36d   :  { %3980 = vmatmul.mubr.msk.f32.vlgmr.msra.gmra.mrb[6].mxu1 %vm174_vm2, %v349_v49  ;;  %3985 = vmatmul.mubr.msk.f32.vlgmr.msra.gmra.mrb[2].mxu0 %vm174_vm2, %v503_v50 }
 0x36e   :  { %3988 = vmatpush3.xpose.msk.msra.mxu1 %vm174_vm2, %v583_v43  ;;  %3989 = vmatprep.mubr.msk.f32.mxu1 %vm4392_vm1, %v4391_v14 }
 0x36f   :  { %3997 = vmatprep.subr.mxu1 %v4391_v14  ;;  %3994 = vmatprep.mubr.msk.f32.mxu0 %vm4392_vm1, %v4391_v14 }
 0x371   :  { %3990 = vmatmul.mubr.msk.f32.vlgmr.msra.gmra.mrb[8].mxu1 %vm174_vm2, %v581_v51 }
 0x372   :  { %3999 = vmatprep.mubr.msk.f32.mxu1 %vm4392_vm1, %v4391_v14 }
 0x43c   :  { %v4577_v52 = vpop.f32.mrb[0].mxu0 }
 0x43d   :  { %v3976_v53 = vpop.f32.mrb[1].mxu0 }
 0x440   :  { %v4579_v54 = vpop.f32.mrb[6].mxu1  ;;  %v576_v55 = vpop.f32.mrb[2].mxu0 }
 0x441   :  { %v658_v56 = vmul.f32 0.35355338, %v576_v55  ;;  %v3981_v57 = vpop.f32.mrb[7].mxu1  ;;  %v3986_v58 = vpop.f32.mrb[3].mxu0 }
 0x443   :  { %v660_v59 = vsel %vm174_vm2, %v658_v56, -inf }
 0x444   :  { %v654_v60 = vpop.f32.mrb[8].mxu1  ;;  %661 = vmax.xlane.f32.xlu1 %v660_v59 }
 0x445   :  { %v659_v61 = vmul.f32 0.35355338, %v654_v60  ;;  %v3991_v62 = vpop.f32.mrb[9].mxu1 }
 0x447   :  { %v663_v63 = vsel %vm174_vm2, %v659_v61, -inf }
 0x448   :  { %664 = vmax.xlane.f32.xlu0 %v663_v63 }
 0x455   :  { %682 = vrot.lane.b32.xlu1 %v4523_v18, %s4397_s17 }
 0x459   :  { %836 = vrot.lane.b32.xlu1 %v4523_v18, %s4398_s18 }
 0x45d   :  { %914 = vrot.lane.b32.xlu1 %v4527_v19, %s4398_s18 }
 0x45e   :  { %758 = vrot.lane.b32.xlu0 %v4527_v19, %s4397_s17 }
 0x462   :  { %834 = vrot.lane.b32.xlu0 %v4523_v18, %s4399_s19 }
 0x4d1   :  { %v662_v0 = vpop.xlane.xlu1 %661 }
 0x4d2   :  { %v666_v1 = vsub.f32 %v658_v56, %v662_v0 }
 0x4d4   :  { %v668_v2 = vmul.f32 1.442695, %v666_v1 }
 0x4d5   :  { %v683_v3 = vpop.permute.xlu1 %682  ;;  %v665_v4 = vpop.xlane.xlu0 %664 }
 0x4d6   :  { %4319 = vpow2.f32 %v668_v2  ;;  %v667_v5 = vsub.f32 %v659_v61, %v665_v4  ;;  %3993 = vmatpush3.msra.mxu0 %v683_v3 }
 0x4d7   :  { %4002 = vmatprep.subr.mxu0 %v4391_v14 }
 0x4d8   :  { %v670_v6 = vmul.f32 1.442695, %v667_v5 }
 0x4d9   :  { %v759_v7 = vpop.permute.xlu0 %758  ;;  %v837_v15 = vpop.permute.xlu1 %836 }
 0x4da   :  { %4321 = vpow2.f32 %v670_v6  ;;  %3998 = vmatpush3.msra.mxu1 %v759_v7 }
 0x4db   :  { %4007 = vmatprep.subr.mxu1 %v4391_v14 }
 0x4dd   :  { %v915_v16 = vpop.permute.xlu1 %914  ;;  %v835_v25 = vpop.permute.xlu0 %834 }
 0x4e0   :  { %v4320_v8 = vpop.eup %4319 }
 0x4e1   :  { %v672_v9 = vsel %vm174_vm2, %v4320_v8, 0.0 }
 0x4e2   :  { %673 = vadd.xlane.f32.xlu1 %v672_v9 }
 0x4e4   :  { %v4322_v10 = vpop.eup %4321 }
 0x4e5   :  { %v675_v11 = vsel %vm174_vm2, %v4322_v10, 0.0 }
 0x4e6   :  { %676 = vadd.xlane.f32.xlu1 %v675_v11 }
 0x4f7   :  { %912 = vrot.lane.b32.xlu1 %v4527_v19, %s4399_s19 }
 0x56f   :  { %v674_v17 = vpop.xlane.xlu1 %673 }
 0x570   :  { %4323 = vrcp.f32 %v674_v17 }
 0x573   :  { %v677_v20 = vpop.xlane.xlu1 %676 }
 0x574   :  { %4325 = vrcp.f32 %v677_v20 }
 0x577   :  { %v913_v26 = vpop.permute.xlu1 %912 }
 0x57a   :  { %v4324_v21 = vpop.eup %4323 }
 0x57b   :  { %v679_v22 = vmul.f32 %v4324_v21, %v4320_v8 }
 0x57d   :  { %3995 = vmatmul.mubr.msk.f32.vlgmr.msra.gmra.mrb[4].mxu0 %vm174_vm2, %v679_v22 }
 0x57e   :  { %v4326_v23 = vpop.eup %4325  ;;  %4003 = vmatpush3.xpose.msk.msra.mxu0 %vm174_vm2, %v837_v15  ;;  %4004 = vmatprep.mubr.msk.f32.mxu0 %vm4392_vm1, %v4391_v14 }
 0x57f   :  { %v681_v24 = vmul.f32 %v4326_v23, %v4322_v10  ;;  %4012 = vmatprep.subr.mxu0 %v4391_v14 }
 0x581   :  { %4000 = vmatmul.mubr.msk.f32.vlgmr.msra.gmra.mrb[10].mxu1 %vm174_vm2, %v681_v24  ;;  %4005 = vmatmul.mubr.msk.f32.vlgmr.msra.gmra.mrb[6].mxu0 %vm174_vm2, %v835_v25 }
 0x582   :  { %4008 = vmatpush3.xpose.msk.msra.mxu1 %vm174_vm2, %v915_v16  ;;  %4009 = vmatprep.mubr.msk.f32.mxu1 %vm4392_vm1, %v4391_v14 }
 0x583   :  { %4017 = vmatprep.subr.mxu1 %v4391_v14  ;;  %4014 = vmatprep.mubr.msk.f32.mxu0 %vm4392_vm1, %v4391_v14 }
 0x585   :  { %4010 = vmatmul.mubr.msk.f32.vlgmr.msra.gmra.mrb[12].mxu1 %vm174_vm2, %v913_v26 }
 0x586   :  { %4019 = vmatprep.mubr.msk.f32.mxu1 %vm4392_vm1, %v4391_v14 }
 0x650   :  { %v4615_v27 = vpop.f32.mrb[4].mxu0 }
 0x651   :  { %v3996_v28 = vpop.f32.mrb[5].mxu0 }
 0x654   :  { %v4617_v29 = vpop.f32.mrb[10].mxu1  ;;  %v908_v30 = vpop.f32.mrb[6].mxu0 }
 0x655   :  { %v990_v31 = vmul.f32 0.35355338, %v908_v30  ;;  %v4001_v32 = vpop.f32.mrb[11].mxu1  ;;  %v4006_v33 = vpop.f32.mrb[7].mxu0 }
 0x656   :  { %v61_v33 = vld [vmem:[%s5046_s4 + $0x8] sm:$0xff] }
 0x657   :  { %v992_v34 = vsel %vm174_vm2, %v990_v31, -inf }
 0x658   :  { %v986_v35 = vpop.f32.mrb[12].mxu1  ;;  %993 = vmax.xlane.f32.xlu0 %v992_v34 }
 0x659   :  { %v991_v36 = vmul.f32 0.35355338, %v986_v35  ;;  %v4011_v37 = vpop.f32.mrb[13].mxu1  ;;  %v62_v35 = vld [vmem:[%s5046_s4 + $0x10] sm:$0xff] }
 0x65b   :  { %v995_v38 = vsel %vm174_vm2, %v991_v36, -inf }
 0x65c   :  { %996 = vmax.xlane.f32.xlu1 %v995_v38 }
 0x66d   :  { %1014 = vrot.lane.b32.xlu1 %v4523_v18, %s4400_s20 }
 0x66e   :  { %1090 = vrot.lane.b32.xlu0 %v4527_v19, %s4400_s20 }
 0x671   :  { %1168 = vrot.lane.b32.xlu1 %v4523_v18, %s5067_s21 }
 0x675   :  { %1246 = vrot.lane.b32.xlu1 %v4527_v19, %s5067_s21 }
 0x679   :  { %1244 = vrot.lane.b32.xlu1 %v4527_v19, %s5065_s22 }
 0x6e5   :  { %v994_v39 = vpop.xlane.xlu0 %993 }
 0x6e6   :  { %v998_v40 = vsub.f32 %v990_v31, %v994_v39 }
 0x6e8   :  { %v1000_v41 = vmul.f32 1.442695, %v998_v40 }
 0x6e9   :  { %v997_v42 = vpop.xlane.xlu1 %996  ;;  %v1091_v43 = vpop.permute.xlu0 %1090 }
 0x6ea   :  { %4327 = vpow2.f32 %v1000_v41  ;;  %v999_v44 = vsub.f32 %v991_v36, %v997_v42  ;;  %4018 = vmatpush3.msra.mxu1 %v1091_v43  ;;  %v63_v36 = vld [vmem:[%s5046_s4 + $0x18] sm:$0xff] }
 0x6eb   :  { %4027 = vmatprep.subr.mxu1 %v4391_v14  ;;  %v4227_v37 = vpack.c.bf16 %v63_v36, %v62_v35 }
 0x6ec   :  { %v1002_v45 = vmul.f32 1.442695, %v999_v44 }
 0x6ed   :  { %v1015_v46 = vpop.permute.xlu1 %1014 }
 0x6ee   :  { %4329 = vpow2.f32 %v1002_v45  ;;  %4013 = vmatpush3.msra.mxu0 %v1015_v46 }
 0x6ef   :  { %4022 = vmatprep.subr.mxu0 %v4391_v14 }
 0x6f1   :  { %v1169_v55 = vpop.permute.xlu1 %1168 }
 0x6f4   :  { %v4328_v47 = vpop.eup %4327 }
 0x6f5   :  { %v1004_v48 = vsel %vm174_vm2, %v4328_v47, 0.0  ;;  %v1247_v59 = vpop.permute.xlu1 %1246 }
 0x6f6   :  { %1005 = vadd.xlane.f32.xlu0 %v1004_v48 }
 0x6f8   :  { %v4330_v49 = vpop.eup %4329 }
 0x6f9   :  { %v1007_v50 = vsel %vm174_vm2, %v4330_v49, 0.0  ;;  %v1245_v62 = vpop.permute.xlu1 %1244 }
 0x6fa   :  { %1008 = vadd.xlane.f32.xlu0 %v1007_v50 }
 0x710   :  { %1166 = vrot.lane.b32.xlu0 %v4523_v18, %s5065_s22 }
 0x783   :  { %v1006_v51 = vpop.xlane.xlu0 %1005 }
 0x784   :  { %4331 = vrcp.f32 %v1006_v51 }
 0x787   :  { %v1009_v53 = vpop.xlane.xlu0 %1008 }
 0x788   :  { %4333 = vrcp.f32 %v1009_v53 }
 0x78b   :  { %v1167_v61 = vpop.permute.xlu0 %1166 }
 0x78e   :  { %v4332_v56 = vpop.eup %4331 }
 0x78f   :  { %v1011_v57 = vmul.f32 %v4332_v56, %v4328_v47 }
 0x791   :  { %4015 = vmatmul.mubr.msk.f32.vlgmr.msra.gmra.mrb[8].mxu0 %vm174_vm2, %v1011_v57 }
 0x792   :  { %v4334_v58 = vpop.eup %4333  ;;  %4023 = vmatpush3.xpose.msk.msra.mxu0 %vm174_vm2, %v1169_v55  ;;  %4024 = vmatprep.mubr.msk.f32.mxu0 %vm4392_vm1, %v4391_v14 }
 0x793   :  { %v1013_v60 = vmul.f32 %v4334_v58, %v4330_v49  ;;  %4032 = vmatprep.subr.mxu0 %v4391_v14 }
 0x795   :  { %4020 = vmatmul.mubr.msk.f32.vlgmr.msra.gmra.mrb[14].mxu1 %vm174_vm2, %v1013_v60  ;;  %4025 = vmatmul.mubr.msk.f32.vlgmr.msra.gmra.mrb[10].mxu0 %vm174_vm2, %v1167_v61 }
 0x796   :  { %4028 = vmatpush3.xpose.msk.msra.mxu1 %vm174_vm2, %v1247_v59  ;;  %4029 = vmatprep.mubr.msk.f32.mxu1 %vm4392_vm1, %v4391_v14 }
 0x797   :  { %4037 = vmatprep.subr.mxu1 %v4391_v14  ;;  %4034 = vmatprep.mubr.msk.f32.mxu0 %vm4392_vm1, %v4391_v14 }
 0x799   :  { %4030 = vmatmul.mubr.msk.f32.vlgmr.msra.gmra.mrb[16].mxu1 %vm174_vm2, %v1245_v62 }
 0x79a   :  { %4039 = vmatprep.mubr.msk.f32.mxu1 %vm4392_vm1, %v4391_v14 }
 0x864   :  { %v1086_v63 = vpop.f32.mrb[8].mxu0 }
 0x865   :  { %v4016_v0 = vpop.f32.mrb[9].mxu0 }
 0x868   :  { %v1162_v1 = vpop.f32.mrb[14].mxu1  ;;  %v1240_v2 = vpop.f32.mrb[10].mxu0 }
 0x869   :  { %v1322_v3 = vmul.f32 0.35355338, %v1240_v2  ;;  %v4021_v4 = vpop.f32.mrb[15].mxu1  ;;  %v4026_v5 = vpop.f32.mrb[11].mxu0 }
 0x86b   :  { %v1324_v6 = vsel %vm174_vm2, %v1322_v3, -inf }
 0x86c   :  { %v1318_v7 = vpop.f32.mrb[16].mxu1  ;;  %1325 = vmax.xlane.f32.xlu0 %v1324_v6 }
 0x86d   :  { %v1323_v8 = vmul.f32 0.35355338, %v1318_v7  ;;  %v4031_v9 = vpop.f32.mrb[17].mxu1 }
 0x86f   :  { %v1327_v10 = vsel %vm174_vm2, %v1323_v8, -inf }
 0x870   :  { %1328 = vmax.xlane.f32.xlu1 %v1327_v10  ;;  %v67_v10 = vld [vmem:[%s5048_s6 + $0x10] sm:$0xff] }
 0x881   :  { %1346 = vrot.lane.b32.xlu1 %v4523_v18, %s5061_s23 }
 0x885   :  { %1500 = vrot.lane.b32.xlu1 %v4615_v27, %s5059_s24 }
 0x889   :  { %1502 = vrot.lane.b32.xlu1 %v4617_v29, %s5059_s24 }
 0x88d   :  { %1510 = vrot.lane.b32.xlu1 %v1162_v1, %s5057_s25 }
 0x8f9   :  { %v1326_v11 = vpop.xlane.xlu0 %1325 }
 0x8fa   :  { %v1330_v15 = vsub.f32 %v1322_v3, %v1326_v11  ;;  %v68_v11 = vld [vmem:[%s5048_s6 + $0x18] sm:$0xff] }
 0x8fc   :  { %v1332_v16 = vmul.f32 1.442695, %v1330_v15  ;;  %v4235_v15 = vpack.c.bf16 %v68_v11, %v67_v10 }
 0x8fd   :  { %v1329_v17 = vpop.xlane.xlu1 %1328 }
 0x8fe   :  { %4335 = vpow2.f32 %v1332_v16  ;;  %v1331_v20 = vsub.f32 %v1323_v8, %v1329_v17  ;;  %v66_v8 = vld [vmem:[%s5048_s6 + $0x8] sm:$0xff]  ;;  %v70_v16 = vld [vmem:[%s5049_s8] sm:$0xff] }
 0x8ff   :  { %v71_v17 = vld [vmem:[%s5049_s8 + $0x8] sm:$0xff] }
 0x900   :  { %v1334_v21 = vmul.f32 1.442695, %v1331_v20  ;;  %v72_v20 = vld [vmem:[%s5049_s8 + $0x10] sm:$0xff] }
 0x901   :  { %v1347_v22 = vpop.permute.xlu1 %1346 }
 0x902   :  { %4337 = vpow2.f32 %v1334_v21  ;;  %4033 = vmatpush3.msra.mxu0 %v1347_v22  ;;  %v4239_v21 = vpack.c.bf16 %v71_v17, %v70_v16  ;;  %v73_v22 = vld [vmem:[%s5049_s8 + $0x18] sm:$0xff] }
 0x905   :  { %v1501_v42 = vpop.permute.xlu1 %1500 }
 0x906   :  { %v1522_v45 = vsel %vm174_vm2, %v4577_v52, %v1501_v42  ;;  %v3750_v52 = vld [vmem:[%s5047_s5] ss:$0 sm:$0xff]  ;;  %v77_v42 = vld [vmem:[%s5049_s8 + $0x38] sm:$0xff] }
 0x908   :  { %v4336_v18 = vpop.eup %4335 }
 0x909   :  { %v1336_v23 = vsel %vm174_vm2, %v4336_v18, 0.0  ;;  %v1503_v43 = vpop.permute.xlu1 %1502 }
 0x90a   :  { %1337 = vadd.xlane.f32.xlu0 %v1336_v23  ;;  %v1523_v50 = vsel %vm174_vm2, %v4579_v54, %v1503_v43  ;;  %v74_v23 = vld [vmem:[%s5049_s8 + $0x20] sm:$0xff] }
 0x90c   :  { %v4338_v24 = vpop.eup %4337 }
 0x90d   :  { %v1339_v25 = vsel %vm174_vm2, %v4338_v24, 0.0  ;;  %v1511_v46 = vpop.permute.xlu1 %1510 }
 0x90e   :  { %1340 = vadd.xlane.f32.xlu0 %v1339_v25  ;;  %v1526_v51 = vsel %vm1524_vm4, %v1523_v50, %v1511_v46 }
 0x924   :  { %1422 = vrot.lane.b32.xlu0 %v4527_v19, %s5061_s23  ;;  %v60_v19 = vld [vmem:[%s5046_s4] sm:$0xff] }
 0x925   :  { %v4223_v34 = vpack.c.bf16 %v61_v33, %v60_v19  ;;  %v3753_v19 = vld [vmem:[%s5050_s10] ss:$0 sm:$0xff] }
 0x927   :  { %4224 = vmatprep.subr.bf16.mxu0 %v4223_v34 }
 0x928   :  { %1508 = vrot.lane.b32.xlu0 %v1086_v63, %s5057_s25 }
 0x997   :  { %v1338_v26 = vpop.xlane.xlu0 %1337 }
 0x998   :  { %4339 = vrcp.f32 %v1338_v26 }
 0x99b   :  { %v1341_v27 = vpop.xlane.xlu0 %1340 }
 0x99c   :  { %4341 = vrcp.f32 %v1341_v27 }
 0x99f   :  { %v1423_v28 = vpop.permute.xlu0 %1422 }
 0x9a0   :  { %4038 = vmatpush3.msra.mxu1 %v1423_v28 }
 0x9a2   :  { %v4340_v29 = vpop.eup %4339 }
 0x9a3   :  { %v1343_v30 = vmul.f32 %v4340_v29, %v4336_v18  ;;  %v1509_v44 = vpop.permute.xlu0 %1508  ;;  %v4243_v18 = vpack.c.bf16 %v73_v22, %v72_v20  ;;  %v3761_v22 = vld [vmem:[%s5054_s12] ss:$0 sm:$0xff] }
 0x9a4   :  { %v1525_v47 = vsel %vm1524_vm4, %v1522_v45, %v1509_v44  ;;  %v3755_v44 = vld [vmem:[%s5052_s7] ss:$0 sm:$0xff] }
 0x9a5   :  { %4035 = vmatmul.mubr.msk.f32.vlgmr.msra.gmra.mrb[12].mxu0 %vm174_vm2, %v1343_v30 }
 0x9a6   :  { %v4342_v31 = vpop.eup %4341  ;;  %4226 = vmatpush3.bf16.msra.mxu0 %v4223_v34  ;;  %v3754_v34 = vld [vmem:[%s5051_s11] ss:$0 sm:$0xff] }
 0x9a7   :  { %v1345_v32 = vmul.f32 %v4342_v31, %v4338_v24  ;;  %4228 = vmatprep.subr.bf16.mxu0 %v4227_v37  ;;  %v75_v24 = vld [vmem:[%s5049_s8 + $0x28] sm:$0xff] }
 0x9a8   :  { %v4247_v25 = vpack.c.bf16 %v75_v24, %v74_v23 }
 0x9a9   :  { %4040 = vmatmul.mubr.msk.f32.vlgmr.msra.gmra.mrb[18].mxu1 %vm174_vm2, %v1345_v32 }
 0x9aa   :  { %4230 = vmatpush3.bf16.msra.mxu0 %v4227_v37 }
 0x9ab   :  { %4240 = vmatprep.subr.bf16.mxu0 %v4239_v21 }
 0xa78   :  { %v1418_v38 = vpop.f32.mrb[12].mxu0 }
 0xa79   :  { %1516 = vrot.lane.b32.xlu0 %v1418_v38, %s5063_s26  ;;  %v4036_v39 = vpop.f32.mrb[13].mxu0 }
 0xa7c   :  { %v1494_v40 = vpop.f32.mrb[18].mxu1 }
 0xa7d   :  { %1518 = vrot.lane.b32.xlu1 %v1494_v40, %s5063_s26  ;;  %v4041_v41 = vpop.f32.mrb[19].mxu1 }
 0xa7e   :  { %v76_v41 = vld [vmem:[%s5049_s8 + $0x30] sm:$0xff] }
 0xa7f   :  { %v4251_v43 = vpack.c.bf16 %v77_v42, %v76_v41 }
 0xaeb   :  { %v1517_v48 = vpop.permute.xlu0 %1516 }
 0xaec   :  { %v1528_v49 = vsel %vm1527_vm3, %v1525_v47, %v1517_v48 }
 0xaed   :  { %4050 = vmatprep.mubr.msk.f32.mxu0 %vm89_vm0, %v1528_v49 }
 0xaef   :  { %v1519_v53 = vpop.permute.xlu1 %1518 }
 0xaf0   :  { %v1529_v55 = vsel %vm1527_vm3, %v1526_v51, %v1519_v53  ;;  %v3758_v51 = vld [vmem:[%s5053_s9] ss:$0 sm:$0xff] }
 0xaf1   :  { %4051 = vmatmul.mubr.msk.f32.vlgmr.msra.gmra.mrb[14].mxu0 %vm89_vm0, %v1529_v55 }
 0xaf2   :  { %4242 = vmatpush3.bf16.msra.mxu0 %v4239_v21 }
 0xaf3   :  { %4244 = vmatprep.subr.bf16.mxu0 %v4243_v18 }
 0xaf6   :  { %4246 = vmatpush3.bf16.msra.mxu0 %v4243_v18 }
 0xaf7   :  { %4248 = vmatprep.subr.bf16.mxu0 %v4247_v25 }
 0xafa   :  { %4250 = vmatpush3.bf16.msra.mxu0 %v4247_v25  ;;  %v3762_v25 = vld [vmem:[%s5055_s13] ss:$0 sm:$0xff] }
 0xafb   :  { %4252 = vmatprep.subr.bf16.mxu0 %v4251_v43 }
 0xafe   :  { %4254 = vmatpush3.bf16.msra.mxu0 %v4251_v43 }
 0xaff   :  { %4104 = vmatprep.subr.mxu0 %v4391_v14 }
 0xbc4   :  { %v4052_v56 = vpop.f32.mrb[14].mxu0 }
 0xbc5   :  { %v1614_v57 = vadd.f32 %v4052_v56, %v3750_v52  ;;  %v1608_v58 = vpop.f32.mrb[15].mxu0 }
 0xbc6   :  { %v1609_v59 = vadd.f32 %v3750_v52, %v1608_v58 }
 0xbc7   :  { %v1618_v60 = vadd.f32 %v1614_v57, %v4510_v13 }
 0xbc8   :  { %v1617_v61 = vadd.f32 %v1609_v59, %v4506_v12  ;;  %v65_v12 = vld [vmem:[%s5048_s6] sm:$0xff] }
 0xbc9   :  { %v1622_v54 = vsel %vm89_vm0, %v1618_v60, 0.0  ;;  %v4231_v9 = vpack.c.bf16 %v66_v8, %v65_v12  ;;  %v3765_v12 = vld [vmem:[%s5042_s2 + $0x30] sm:$0xff]  ;;  %v3766_v8 = vld [vmem:[%s5042_s2 + $0x38] sm:$0xff] }
 0xbca   :  { %1623 = vadd.xlane.f32.xlu1 %v1622_v54  ;;  %v1619_v62 = vsel %vm89_vm0, %v1617_v61, 0.0 }
 0xbcb   :  { %1620 = vadd.xlane.f32.xlu0 %v1619_v62  ;;  %4232 = vmatprep.subr.bf16.mxu1 %v4231_v9 }
 0xbcc   :  { %4234 = vmatpush3.bf16.msra.mxu1 %v4231_v9  ;;  %v4259_v9 = vpack.c.bf16 %v3766_v8, %v3765_v12 }
 0xbcd   :  { %4236 = vmatprep.subr.bf16.mxu1 %v4235_v15 }
 0xbd0   :  { %4238 = vmatpush3.bf16.msra.mxu1 %v4235_v15 }
 0xc57   :  { %v1624_v63 = vpop.xlane.xlu1 %1623 }
 0xc58   :  { %v1627_v0 = vmul.f32 0.03125, %v1624_v63  ;;  %v1621_v1 = vpop.xlane.xlu0 %1620 }
 0xc59   :  { %v1626_v2 = vmul.f32 0.03125, %v1621_v1 }
 0xc5a   :  { %v1629_v3 = vsub.f32 %v1618_v60, %v1627_v0 }
 0xc5b   :  { %v1628_v4 = vsub.f32 %v1617_v61, %v1626_v2 }
 0xc5c   :  { %v1631_v7 = vmul.f32 %v1629_v3, %v1629_v3 }
 0xc5d   :  { %v1630_v5 = vmul.f32 %v1628_v4, %v1628_v4 }
 0xc5e   :  { %v1635_v13 = vsel %vm89_vm0, %v1631_v7, 0.0  ;;  %v3764_v7 = vld [vmem:[%s5042_s2 + $0x28] sm:$0xff] }
 0xc5f   :  { %v1632_v6 = vsel %vm89_vm0, %v1630_v5, 0.0 }
 0xc60   :  { %1633 = vadd.xlane.f32.xlu0 %v1632_v6  ;;  %v3763_v6 = vld [vmem:[%s5042_s2 + $0x20] sm:$0xff] }
 0xc64   :  { %1636 = vadd.xlane.f32.xlu0 %v1635_v13  ;;  %v4255_v13 = vpack.c.bf16 %v3764_v7, %v3763_v6 }
 0xc66   :  { %4256 = vmatprep.subr.bf16.mxu1 %v4255_v13 }
 0xced   :  { %v1634_v26 = vpop.xlane.xlu0 %1633 }
 0xcee   :  { %v1638_v27 = vmul.f32 0.03125, %v1634_v26 }
 0xcf0   :  { %v1640_v28 = vadd.f32 1e-05, %v1638_v27 }
 0xcf1   :  { %v1637_v29 = vpop.xlane.xlu0 %1636 }
 0xcf2   :  { %4343 = vrsqrt.f32 %v1640_v28  ;;  %v1639_v30 = vmul.f32 0.03125, %v1637_v29 }
 0xcf4   :  { %v1641_v31 = vadd.f32 1e-05, %v1639_v30  ;;  %v3791_v30 = vld [vmem:[%s5045_s3 + $0x1] ss:$0 sm:$0xff]  ;;  %s5069_s3 = smov 72  }
 0xcf6   :  { %4345 = vrsqrt.f32 %v1641_v31 }
 0xcfc   :  { %v4344_v32 = vpop.eup %4343 }
 0xcfd   :  { %v1644_v33 = vmul.f32 %v4344_v32, %v1628_v4 }
 0xcff   :  { %v1652_v35 = vmul.f32 %v3753_v19, %v1644_v33 }
 0xd00   :  { %v4346_v36 = vpop.eup %4345 }
 0xd01   :  { %v1645_v37 = vmul.f32 %v4346_v36, %v1629_v3  ;;  %v1660_v38 = vadd.f32 %v3754_v34, %v1652_v35 }
 0xd03   :  { %v1653_v39 = vmul.f32 %v3753_v19, %v1645_v37  ;;  %4061 = vmatprep.mubr.msk.f32.mxu1 %vm89_vm0, %v1660_v38 }
 0xd05   :  { %v1661_v40 = vadd.f32 %v3754_v34, %v1653_v39 }
 0xd07   :  { %4062 = vmatmul.mubr.msk.f32.vlgmr.msra.gmra.mrb[20].mxu1 %vm89_vm0, %v1661_v40 }
 0xd08   :  { %4258 = vmatpush3.bf16.msra.mxu1 %v4255_v13 }
 0xd09   :  { %4260 = vmatprep.subr.bf16.mxu1 %v4259_v9 }
 0xd0c   :  { %4262 = vmatpush3.bf16.msra.mxu1 %v4259_v9 }
 0xd0d   :  { %4094 = vmatprep.subr.mxu1 %v4391_v14 }
 0xdda   :  { %v4063_v45 = vpop.f32.mrb[20].mxu1 }
 0xddb   :  { %v1746_v46 = vadd.f32 %v4063_v45, %v3755_v44  ;;  %v1740_v47 = vpop.f32.mrb[21].mxu1 }
 0xddc   :  { %v1741_v48 = vadd.f32 %v3755_v44, %v1740_v47 }
 0xddd   :  { %v1750_v50 = vmax.f32 %v1746_v46, 0.0 }
 0xdde   :  { %v1749_v49 = vmax.f32 %v1741_v48, 0.0 }
 0xde0   :  { %4080 = vmatprep.mubr.msk.f32.mxu0 %vm1757_vm5, %v1749_v49 }
 0xde1   :  { %4081 = vmatmul.mubr.msk.f32.vlgmr.msra.gmra.mrb[16].mxu0 %vm1757_vm5, %v1750_v50 }
 0xde2   :  { %4106 = vmatprep.mubr.msk.f32.mxu0 %vm4392_vm1, %v4391_v14 }
 0xeb4   :  { %v4082_v53 = vpop.f32.mrb[16].mxu0 }
 0xeb5   :  { %v1836_v55 = vadd.f32 %v4082_v53, %v3758_v51  ;;  %v1830_v52 = vpop.f32.mrb[17].mxu0 }
 0xeb6   :  { %v1831_v56 = vadd.f32 %v3758_v51, %v1830_v52 }
 0xeb7   :  { %v1840_v57 = vadd.f32 %v1836_v55, %v1661_v40 }
 0xeb8   :  { %v1839_v58 = vadd.f32 %v1831_v56, %v1660_v38 }
 0xeb9   :  { %v1844_v59 = vsel %vm89_vm0, %v1840_v57, 0.0 }
 0xeba   :  { %1845 = vadd.xlane.f32.xlu0 %v1844_v59  ;;  %v1841_v60 = vsel %vm89_vm0, %v1839_v58, 0.0 }
 0xebb   :  { %1842 = vadd.xlane.f32.xlu1 %v1841_v60 }
 0xf47   :  { %v1846_v61 = vpop.xlane.xlu0 %1845 }
 0xf48   :  { %v1848_v54 = vmul.f32 0.03125, %v1846_v61  ;;  %v1843_v62 = vpop.xlane.xlu1 %1842 }
 0xf49   :  { %v1847_v63 = vmul.f32 0.03125, %v1843_v62 }
 0xf4a   :  { %v1850_v0 = vsub.f32 %v1840_v57, %v1848_v54 }
 0xf4b   :  { %v1849_v1 = vsub.f32 %v1839_v58, %v1847_v63 }
 0xf4c   :  { %v1852_v2 = vmul.f32 %v1850_v0, %v1850_v0 }
 0xf4d   :  { %v1851_v3 = vmul.f32 %v1849_v1, %v1849_v1 }
 0xf4e   :  { %v1856_v4 = vsel %vm89_vm0, %v1852_v2, 0.0 }
 0xf4f   :  { %1857 = vadd.xlane.f32.xlu0 %v1856_v4  ;;  %v1853_v5 = vsel %vm89_vm0, %v1851_v3, 0.0 }
 0xf50   :  { %1854 = vadd.xlane.f32.xlu1 %v1853_v5 }
 0xfdc   :  { %v1858_v10 = vpop.xlane.xlu0 %1857 }
 0xfdd   :  { %v1860_v11 = vmul.f32 0.03125, %v1858_v10  ;;  %v1855_v15 = vpop.xlane.xlu1 %1854 }
 0xfde   :  { %v1859_v16 = vmul.f32 0.03125, %v1855_v15 }
 0xfdf   :  { %v1862_v17 = vadd.f32 1e-05, %v1860_v11 }
 0xfe0   :  { %v1861_v20 = vadd.f32 1e-05, %v1859_v16 }
 0xfe1   :  { %4347 = vrsqrt.f32 %v1862_v17 }
 0xfe2   :  { %4349 = vrsqrt.f32 %v1861_v20 }
 0xfeb   :  { %v4348_v21 = vpop.eup %4347 }
 0xfec   :  { %v4350_v18 = vpop.eup %4349  ;;  %v1866_v23 = vmul.f32 %v4348_v21, %v1850_v0 }
 0xfed   :  { %v1865_v24 = vmul.f32 %v4350_v18, %v1849_v1 }
 0xfee   :  { %v1874_v26 = vmul.f32 %v3761_v22, %v1866_v23 }
 0xfef   :  { %v1873_v27 = vmul.f32 %v3761_v22, %v1865_v24 }
 0xff0   :  { %v4782_v29 = vadd.f32 %v3762_v25, %v1874_v26 }
 0xff1   :  { %v4780_v28 = vadd.f32 %v3762_v25, %v1873_v27 }
 0xff3   :  { %4091 = vmatprep.mubr.msk.f32.mxu1 %vm89_vm0, %v4780_v28 }
 0xff4   :  { %4092 = vmatmul.mubr.msk.f32.vlgmr.msra.gmra.mrb[22].mxu1 %vm89_vm0, %v4782_v29 }
 0xff5   :  { %4096 = vmatprep.mubr.msk.f32.mxu1 %vm4392_vm1, %v4391_v14 }
0x10c7   :  { %v4093_v31 = vpop.f32.mrb[22].mxu1 }
0x10c8   :  { %v4793_v32 = vadd.f32 %v4093_v31, %v3791_v30  ;;  %v2001_v19 = vpop.f32.mrb[23].mxu1 }
0x10c9   :  { %v4795_v33 = vadd.f32 %v3791_v30, %v2001_v19 }
0x10ca   :  { %2088 = vrot.lane.b32.xlu0 %v4793_v32, %s4393_s29 }
0x10cb   :  { %2011 = vrot.lane.b32.xlu1 %v4795_v33, %s4393_s29  ;;  %s5070_s29 = smov 104  }
0x113c   :  { %v2089_v35 = vpop.permute.xlu0 %2088 }
0x113d   :  { %v2012_v34 = vpop.permute.xlu1 %2011 }
0x113e   :  { %4095 = vmatpush3.xpose.msk.msra.mxu1 %vm174_vm2, %v2012_v34 }
0x113f   :  { %4099 = vmatprep.subr.mxu1 %v4391_v14 }
0x1141   :  { %4097 = vmatmul.mubr.msk.f32.vlgmr.msra.gmra.mrb[24].mxu1 %vm174_vm2, %v4795_v33 }
0x1142   :  { %4100 = vmatpush3.xpose.msk.msra.mxu1 %vm174_vm2, %v2089_v35  ;;  %4101 = vmatprep.mubr.msk.f32.mxu1 %vm4392_vm1, %v4391_v14 }
0x1143   :  { %4109 = vmatprep.subr.mxu1 %v4391_v14 }
0x1145   :  { %4102 = vmatmul.mubr.msk.f32.vlgmr.msra.gmra.mrb[26].mxu1 %vm174_vm2, %v4793_v32 }
0x1146   :  { %4111 = vmatprep.mubr.msk.f32.mxu1 %vm4392_vm1, %v4391_v14 }
0x1214   :  { %v2083_v36 = vpop.f32.mrb[24].mxu1 }
0x1215   :  { %v2164_v37 = vmul.f32 0.35355338, %v2083_v36  ;;  %v4098_v38 = vpop.f32.mrb[25].mxu1 }
0x1217   :  { %v2166_v39 = vsel %vm174_vm2, %v2164_v37, -inf }
0x1218   :  { %2167 = vmax.xlane.f32.xlu1 %v2166_v39  ;;  %v2160_v40 = vpop.f32.mrb[26].mxu1 }
0x1219   :  { %v2165_v41 = vmul.f32 0.35355338, %v2160_v40  ;;  %v4103_v42 = vpop.f32.mrb[27].mxu1 }
0x121b   :  { %v2169_v43 = vsel %vm174_vm2, %v2165_v41, -inf }
0x121c   :  { %2170 = vmax.xlane.f32.xlu0 %v2169_v43 }
0x1229   :  { %2188 = vrot.lane.b32.xlu1 %v4795_v33, %s4394_s30 }
0x122d   :  { %2342 = vrot.lane.b32.xlu1 %v4795_v33, %s4395_s15 }
0x1231   :  { %2420 = vrot.lane.b32.xlu1 %v4793_v32, %s4395_s15  ;;  %s5072_s15 = smov 8  }
0x1232   :  { %2264 = vrot.lane.b32.xlu0 %v4793_v32, %s4394_s30  ;;  %s5071_s30 = smov 40  }
0x12a5   :  { %v2168_v44 = vpop.xlane.xlu1 %2167 }
0x12a6   :  { %v2172_v45 = vsub.f32 %v2164_v37, %v2168_v44 }
0x12a8   :  { %v2174_v46 = vmul.f32 1.442695, %v2172_v45 }
0x12a9   :  { %v2189_v47 = vpop.permute.xlu1 %2188  ;;  %v2171_v48 = vpop.xlane.xlu0 %2170 }
0x12aa   :  { %4351 = vpow2.f32 %v2174_v46  ;;  %v2173_v49 = vsub.f32 %v2165_v41, %v2171_v48  ;;  %4105 = vmatpush3.msra.mxu0 %v2189_v47 }
0x12ab   :  { %4114 = vmatprep.subr.mxu0 %v4391_v14 }
0x12ac   :  { %v2176_v50 = vmul.f32 1.442695, %v2173_v49 }
0x12ad   :  { %v2265_v51 = vpop.permute.xlu0 %2264  ;;  %v2343_v57 = vpop.permute.xlu1 %2342 }
0x12ae   :  { %4353 = vpow2.f32 %v2176_v50  ;;  %4110 = vmatpush3.msra.mxu1 %v2265_v51 }
0x12af   :  { %4119 = vmatprep.subr.mxu1 %v4391_v14 }
0x12b1   :  { %v2421_v58 = vpop.permute.xlu1 %2420 }
0x12b4   :  { %v4352_v53 = vpop.eup %4351 }
0x12b5   :  { %v2178_v55 = vsel %vm174_vm2, %v4352_v53, 0.0 }
0x12b6   :  { %2179 = vadd.xlane.f32.xlu1 %v2178_v55 }
0x12b8   :  { %v4354_v52 = vpop.eup %4353 }
0x12b9   :  { %v2181_v56 = vsel %vm174_vm2, %v4354_v52, 0.0 }
0x12ba   :  { %2182 = vadd.xlane.f32.xlu0 %v2181_v56 }
0x12c7   :  { %2418 = vrot.lane.b32.xlu1 %v4793_v32, %s4396_s16 }
0x12d0   :  { %2340 = vrot.lane.b32.xlu0 %v4795_v33, %s4396_s16  ;;  %s5073_s16 = smov 16  }
0x1343   :  { %v2180_v59 = vpop.xlane.xlu1 %2179 }
0x1344   :  { %4355 = vrcp.f32 %v2180_v59 }
0x1347   :  { %v2183_v60 = vpop.xlane.xlu0 %2182  ;;  %v2419_v1 = vpop.permute.xlu1 %2418 }
0x1348   :  { %4357 = vrcp.f32 %v2183_v60 }
0x134b   :  { %v2341_v0 = vpop.permute.xlu0 %2340 }
0x134e   :  { %v4356_v61 = vpop.eup %4355 }
0x134f   :  { %v2185_v54 = vmul.f32 %v4356_v61, %v4352_v53 }
0x1351   :  { %4107 = vmatmul.mubr.msk.f32.vlgmr.msra.gmra.mrb[18].mxu0 %vm174_vm2, %v2185_v54 }
0x1352   :  { %v4358_v62 = vpop.eup %4357  ;;  %4115 = vmatpush3.xpose.msk.msra.mxu0 %vm174_vm2, %v2343_v57  ;;  %4116 = vmatprep.mubr.msk.f32.mxu0 %vm4392_vm1, %v4391_v14 }
0x1353   :  { %v2187_v63 = vmul.f32 %v4358_v62, %v4354_v52  ;;  %4124 = vmatprep.subr.mxu0 %v4391_v14 }
0x1355   :  { %4112 = vmatmul.mubr.msk.f32.vlgmr.msra.gmra.mrb[28].mxu1 %vm174_vm2, %v2187_v63  ;;  %4117 = vmatmul.mubr.msk.f32.vlgmr.msra.gmra.mrb[20].mxu0 %vm174_vm2, %v2341_v0 }
0x1356   :  { %4120 = vmatpush3.xpose.msk.msra.mxu1 %vm174_vm2, %v2421_v58  ;;  %4121 = vmatprep.mubr.msk.f32.mxu1 %vm4392_vm1, %v4391_v14 }
0x1357   :  { %4129 = vmatprep.subr.mxu1 %v4391_v14  ;;  %4126 = vmatprep.mubr.msk.f32.mxu0 %vm4392_vm1, %v4391_v14 }
0x1359   :  { %4122 = vmatmul.mubr.msk.f32.vlgmr.msra.gmra.mrb[30].mxu1 %vm174_vm2, %v2419_v1 }
0x135a   :  { %4131 = vmatprep.mubr.msk.f32.mxu1 %vm4392_vm1, %v4391_v14 }
0x1424   :  { %v4847_v2 = vpop.f32.mrb[18].mxu0 }
0x1425   :  { %v4108_v3 = vpop.f32.mrb[19].mxu0 }
0x1428   :  { %v4849_v4 = vpop.f32.mrb[28].mxu1  ;;  %v2414_v5 = vpop.f32.mrb[20].mxu0 }
0x1429   :  { %v2496_v6 = vmul.f32 0.35355338, %v2414_v5  ;;  %v4113_v7 = vpop.f32.mrb[29].mxu1  ;;  %v4118_v13 = vpop.f32.mrb[21].mxu0 }
0x142b   :  { %v2498_v12 = vsel %vm174_vm2, %v2496_v6, -inf }
0x142c   :  { %2499 = vmax.xlane.f32.xlu0 %v2498_v12  ;;  %v2492_v8 = vpop.f32.mrb[30].mxu1 }
0x142d   :  { %v2497_v9 = vmul.f32 0.35355338, %v2492_v8  ;;  %v4123_v10 = vpop.f32.mrb[31].mxu1 }
0x142f   :  { %v2501_v11 = vsel %vm174_vm2, %v2497_v9, -inf }
0x1430   :  { %2502 = vmax.xlane.f32.xlu1 %v2501_v11 }
0x1441   :  { %2520 = vrot.lane.b32.xlu1 %v4795_v33, %s4397_s17 }
0x1442   :  { %2596 = vrot.lane.b32.xlu0 %v4793_v32, %s4397_s17 }
0x1445   :  { %2674 = vrot.lane.b32.xlu1 %v4795_v33, %s4398_s18 }
0x1449   :  { %2752 = vrot.lane.b32.xlu1 %v4793_v32, %s4398_s18 }
0x144d   :  { %2750 = vrot.lane.b32.xlu1 %v4793_v32, %s4399_s19 }
0x14b9   :  { %v2500_v15 = vpop.xlane.xlu0 %2499 }
0x14ba   :  { %v2504_v16 = vsub.f32 %v2496_v6, %v2500_v15 }
0x14bc   :  { %v2506_v17 = vmul.f32 1.442695, %v2504_v16 }
0x14bd   :  { %v2597_v20 = vpop.permute.xlu0 %2596  ;;  %v2503_v21 = vpop.xlane.xlu1 %2502 }
0x14be   :  { %4359 = vpow2.f32 %v2506_v17  ;;  %v2505_v22 = vsub.f32 %v2497_v9, %v2503_v21  ;;  %4130 = vmatpush3.msra.mxu1 %v2597_v20 }
0x14bf   :  { %4139 = vmatprep.subr.mxu1 %v4391_v14 }
0x14c0   :  { %v2508_v18 = vmul.f32 1.442695, %v2505_v22 }
0x14c1   :  { %v2521_v23 = vpop.permute.xlu1 %2520 }
0x14c2   :  { %4361 = vpow2.f32 %v2508_v18  ;;  %4125 = vmatpush3.msra.mxu0 %v2521_v23 }
0x14c3   :  { %4134 = vmatprep.subr.mxu0 %v4391_v14 }
0x14c5   :  { %v2675_v19 = vpop.permute.xlu1 %2674 }
0x14c8   :  { %v4360_v24 = vpop.eup %4359 }
0x14c9   :  { %v2510_v25 = vsel %vm174_vm2, %v4360_v24, 0.0  ;;  %v2753_v37 = vpop.permute.xlu1 %2752 }
0x14ca   :  { %2511 = vadd.xlane.f32.xlu0 %v2510_v25 }
0x14cc   :  { %v4362_v26 = vpop.eup %4361 }
0x14cd   :  { %v2513_v27 = vsel %vm174_vm2, %v4362_v26, 0.0  ;;  %v2751_v40 = vpop.permute.xlu1 %2750 }
0x14ce   :  { %2514 = vadd.xlane.f32.xlu0 %v2513_v27 }
0x14e4   :  { %2672 = vrot.lane.b32.xlu0 %v4795_v33, %s4399_s19 }
0x1557   :  { %v2512_v30 = vpop.xlane.xlu0 %2511 }
0x1558   :  { %4363 = vrcp.f32 %v2512_v30 }
0x155b   :  { %v2515_v31 = vpop.xlane.xlu0 %2514 }
0x155c   :  { %4365 = vrcp.f32 %v2515_v31 }
0x155f   :  { %v2673_v39 = vpop.permute.xlu0 %2672 }
0x1562   :  { %v4364_v34 = vpop.eup %4363 }
0x1563   :  { %v2517_v35 = vmul.f32 %v4364_v34, %v4360_v24 }
0x1565   :  { %4127 = vmatmul.mubr.msk.f32.vlgmr.msra.gmra.mrb[22].mxu0 %vm174_vm2, %v2517_v35 }
0x1566   :  { %v4366_v36 = vpop.eup %4365  ;;  %4135 = vmatpush3.xpose.msk.msra.mxu0 %vm174_vm2, %v2675_v19  ;;  %4136 = vmatprep.mubr.msk.f32.mxu0 %vm4392_vm1, %v4391_v14 }
0x1567   :  { %v2519_v38 = vmul.f32 %v4366_v36, %v4362_v26  ;;  %4144 = vmatprep.subr.mxu0 %v4391_v14 }
0x1569   :  { %4132 = vmatmul.mubr.msk.f32.vlgmr.msra.gmra.mrb[32].mxu1 %vm174_vm2, %v2519_v38  ;;  %4137 = vmatmul.mubr.msk.f32.vlgmr.msra.gmra.mrb[24].mxu0 %vm174_vm2, %v2673_v39 }
0x156a   :  { %4140 = vmatpush3.xpose.msk.msra.mxu1 %vm174_vm2, %v2753_v37  ;;  %4141 = vmatprep.mubr.msk.f32.mxu1 %vm4392_vm1, %v4391_v14 }
0x156b   :  { %4149 = vmatprep.subr.mxu1 %v4391_v14  ;;  %4146 = vmatprep.mubr.msk.f32.mxu0 %vm4392_vm1, %v4391_v14 }
0x156d   :  { %4142 = vmatmul.mubr.msk.f32.vlgmr.msra.gmra.mrb[34].mxu1 %vm174_vm2, %v2751_v40 }
0x156e   :  { %4151 = vmatprep.mubr.msk.f32.mxu1 %vm4392_vm1, %v4391_v14 }
0x1638   :  { %v4885_v41 = vpop.f32.mrb[22].mxu0 }
0x1639   :  { %v4128_v42 = vpop.f32.mrb[23].mxu0 }
0x163c   :  { %v4887_v43 = vpop.f32.mrb[32].mxu1  ;;  %v2746_v44 = vpop.f32.mrb[24].mxu0 }
0x163d   :  { %v2828_v45 = vmul.f32 0.35355338, %v2746_v44  ;;  %v4133_v46 = vpop.f32.mrb[33].mxu1  ;;  %v4138_v47 = vpop.f32.mrb[25].mxu0 }
0x163e   :  { %v3769_v46 = vld [vmem:[%s5046_s4 + $0x28] sm:$0xff] }
0x163f   :  { %v2830_v48 = vsel %vm174_vm2, %v2828_v45, -inf }
0x1640   :  { %2831 = vmax.xlane.f32.xlu0 %v2830_v48  ;;  %v2824_v49 = vpop.f32.mrb[34].mxu1  ;;  %v3770_v48 = vld [vmem:[%s5046_s4 + $0x30] sm:$0xff] }
0x1641   :  { %v2829_v50 = vmul.f32 0.35355338, %v2824_v49  ;;  %v4143_v51 = vpop.f32.mrb[35].mxu1  ;;  %v3771_v49 = vld [vmem:[%s5046_s4 + $0x38] sm:$0xff] }
0x1643   :  { %v2833_v53 = vsel %vm174_vm2, %v2829_v50, -inf }
0x1644   :  { %2834 = vmax.xlane.f32.xlu1 %v2833_v53 }
0x1655   :  { %2852 = vrot.lane.b32.xlu1 %v4795_v33, %s4400_s20 }
0x1656   :  { %2928 = vrot.lane.b32.xlu0 %v4793_v32, %s4400_s20 }
0x1659   :  { %3006 = vrot.lane.b32.xlu1 %v4795_v33, %s5069_s3 }
0x165d   :  { %3084 = vrot.lane.b32.xlu1 %v4793_v32, %s5069_s3 }
0x1661   :  { %3082 = vrot.lane.b32.xlu1 %v4793_v32, %s5070_s29 }
0x16cd   :  { %v2832_v55 = vpop.xlane.xlu0 %2831 }
0x16ce   :  { %v2836_v52 = vsub.f32 %v2828_v45, %v2832_v55 }
0x16d0   :  { %v2838_v56 = vmul.f32 1.442695, %v2836_v52 }
0x16d1   :  { %v2929_v57 = vpop.permute.xlu0 %2928  ;;  %v2835_v58 = vpop.xlane.xlu1 %2834 }
0x16d2   :  { %4367 = vpow2.f32 %v2838_v56  ;;  %v2837_v59 = vsub.f32 %v2829_v50, %v2835_v58  ;;  %4150 = vmatpush3.msra.mxu1 %v2929_v57  ;;  %v4267_v50 = vpack.c.bf16 %v3771_v49, %v3770_v48 }
0x16d3   :  { %4159 = vmatprep.subr.mxu1 %v4391_v14 }
0x16d4   :  { %v2840_v60 = vmul.f32 1.442695, %v2837_v59 }
0x16d5   :  { %v2853_v61 = vpop.permute.xlu1 %2852 }
0x16d6   :  { %4369 = vpow2.f32 %v2840_v60  ;;  %4145 = vmatpush3.msra.mxu0 %v2853_v61 }
0x16d7   :  { %4154 = vmatprep.subr.mxu0 %v4391_v14 }
0x16d9   :  { %v3007_v5 = vpop.permute.xlu1 %3006 }
0x16dc   :  { %v4368_v54 = vpop.eup %4367 }
0x16dd   :  { %v2842_v62 = vsel %vm174_vm2, %v4368_v54, 0.0  ;;  %v3085_v12 = vpop.permute.xlu1 %3084 }
0x16de   :  { %2843 = vadd.xlane.f32.xlu0 %v2842_v62 }
0x16e0   :  { %v4370_v63 = vpop.eup %4369 }
0x16e1   :  { %v2845_v0 = vsel %vm174_vm2, %v4370_v63, 0.0  ;;  %v3083_v10 = vpop.permute.xlu1 %3082 }
0x16e2   :  { %2846 = vadd.xlane.f32.xlu0 %v2845_v0 }
0x16f8   :  { %3004 = vrot.lane.b32.xlu0 %v4795_v33, %s5070_s29 }
0x176b   :  { %v2844_v1 = vpop.xlane.xlu0 %2843 }
0x176c   :  { %4371 = vrcp.f32 %v2844_v1 }
0x176f   :  { %v2847_v3 = vpop.xlane.xlu0 %2846 }
0x1770   :  { %4373 = vrcp.f32 %v2847_v3 }
0x1773   :  { %v3005_v9 = vpop.permute.xlu0 %3004 }
0x1776   :  { %v4372_v6 = vpop.eup %4371 }
0x1777   :  { %v2849_v7 = vmul.f32 %v4372_v6, %v4368_v54 }
0x1779   :  { %4147 = vmatmul.mubr.msk.f32.vlgmr.msra.gmra.mrb[26].mxu0 %vm174_vm2, %v2849_v7 }
0x177a   :  { %v4374_v13 = vpop.eup %4373  ;;  %4155 = vmatpush3.xpose.msk.msra.mxu0 %vm174_vm2, %v3007_v5  ;;  %4156 = vmatprep.mubr.msk.f32.mxu0 %vm4392_vm1, %v4391_v14 }
0x177b   :  { %v2851_v8 = vmul.f32 %v4374_v13, %v4370_v63  ;;  %4164 = vmatprep.subr.mxu0 %v4391_v14 }
0x177d   :  { %4152 = vmatmul.mubr.msk.f32.vlgmr.msra.gmra.mrb[36].mxu1 %vm174_vm2, %v2851_v8  ;;  %4157 = vmatmul.mubr.msk.f32.vlgmr.msra.gmra.mrb[28].mxu0 %vm174_vm2, %v3005_v9 }
0x177e   :  { %4160 = vmatpush3.xpose.msk.msra.mxu1 %vm174_vm2, %v3085_v12  ;;  %4161 = vmatprep.mubr.msk.f32.mxu1 %vm4392_vm1, %v4391_v14 }
0x177f   :  { %4169 = vmatprep.subr.mxu1 %v4391_v14  ;;  %4166 = vmatprep.mubr.msk.f32.mxu0 %vm4392_vm1, %v4391_v14 }
0x1781   :  { %4162 = vmatmul.mubr.msk.f32.vlgmr.msra.gmra.mrb[38].mxu1 %vm174_vm2, %v3083_v10 }
0x1782   :  { %4171 = vmatprep.mubr.msk.f32.mxu1 %vm4392_vm1, %v4391_v14 }
0x184c   :  { %v2924_v11 = vpop.f32.mrb[26].mxu0 }
0x184d   :  { %v4148_v15 = vpop.f32.mrb[27].mxu0 }
0x1850   :  { %v3000_v16 = vpop.f32.mrb[36].mxu1  ;;  %v3078_v17 = vpop.f32.mrb[28].mxu0 }
0x1851   :  { %v3160_v20 = vmul.f32 0.35355338, %v3078_v17  ;;  %v4153_v21 = vpop.f32.mrb[37].mxu1  ;;  %v4158_v22 = vpop.f32.mrb[29].mxu0 }
0x1853   :  { %v3162_v18 = vsel %vm174_vm2, %v3160_v20, -inf }
0x1854   :  { %3163 = vmax.xlane.f32.xlu0 %v3162_v18  ;;  %v3156_v23 = vpop.f32.mrb[38].mxu1 }
0x1855   :  { %v3161_v24 = vmul.f32 0.35355338, %v3156_v23  ;;  %v4163_v25 = vpop.f32.mrb[39].mxu1  ;;  %v3774_v23 = vld [vmem:[%s5048_s6 + $0x28] sm:$0xff] }
0x1856   :  { %v3775_v25 = vld [vmem:[%s5048_s6 + $0x30] sm:$0xff] }
0x1857   :  { %v3165_v26 = vsel %vm174_vm2, %v3161_v24, -inf }
0x1858   :  { %3166 = vmax.xlane.f32.xlu1 %v3165_v26  ;;  %v3776_v26 = vld [vmem:[%s5048_s6 + $0x38] sm:$0xff] }
0x1869   :  { %3184 = vrot.lane.b32.xlu1 %v4795_v33, %s5071_s30 }
0x186d   :  { %3338 = vrot.lane.b32.xlu1 %v4885_v41, %s5072_s15 }
0x1871   :  { %3340 = vrot.lane.b32.xlu1 %v4887_v43, %s5072_s15 }
0x1875   :  { %3348 = vrot.lane.b32.xlu1 %v3000_v16, %s5073_s16 }
0x18e1   :  { %v3164_v14 = vpop.xlane.xlu0 %3163 }
0x18e2   :  { %v3168_v27 = vsub.f32 %v3160_v20, %v3164_v14  ;;  %v4275_v14 = vpack.c.bf16 %v3776_v26, %v3775_v25  ;;  %v3829_v25 = vld [vmem:[%s5054_s12 + $0x1] ss:$0 sm:$0xff] }
0x18e4   :  { %v3170_v30 = vmul.f32 1.442695, %v3168_v27  ;;  %v3778_v27 = vld [vmem:[%s5049_s8 + $0x40] sm:$0xff] }
0x18e5   :  { %v3167_v31 = vpop.xlane.xlu1 %3166 }
0x18e6   :  { %4375 = vpow2.f32 %v3170_v30  ;;  %v3169_v19 = vsub.f32 %v3161_v24, %v3167_v31  ;;  %v3779_v30 = vld [vmem:[%s5049_s8 + $0x48] sm:$0xff]  ;;  %v3780_v31 = vld [vmem:[%s5049_s8 + $0x50] sm:$0xff] }
0x18e8   :  { %v3172_v34 = vmul.f32 1.442695, %v3169_v19  ;;  %v4279_v19 = vpack.c.bf16 %v3779_v30, %v3778_v27  ;;  %v3830_v27 = vld [vmem:[%s5055_s13 + $0x1] ss:$0 sm:$0xff] }
0x18e9   :  { %v3185_v35 = vpop.permute.xlu1 %3184 }
0x18ea   :  { %4377 = vpow2.f32 %v3172_v34  ;;  %4165 = vmatpush3.msra.mxu0 %v3185_v35  ;;  %v3781_v34 = vld [vmem:[%s5049_s8 + $0x58] sm:$0xff] }
0x18eb   :  { %v4283_v35 = vpack.c.bf16 %v3781_v34, %v3780_v31 }
0x18ed   :  { %v3339_v56 = vpop.permute.xlu1 %3338 }
0x18ee   :  { %v3360_v59 = vsel %vm174_vm2, %v4847_v2, %v3339_v56  ;;  %v3818_v2 = vld [vmem:[%s5047_s5 + $0x1] ss:$0 sm:$0xff] }
0x18f0   :  { %v4376_v36 = vpop.eup %4375 }
0x18f1   :  { %v3174_v33 = vsel %vm174_vm2, %v4376_v36, 0.0  ;;  %v3341_v57 = vpop.permute.xlu1 %3340 }
0x18f2   :  { %3175 = vadd.xlane.f32.xlu0 %v3174_v33  ;;  %v3361_v63 = vsel %vm174_vm2, %v4849_v4, %v3341_v57  ;;  %v3783_v33 = vld [vmem:[%s5049_s8 + $0x68] sm:$0xff]  ;;  %v3823_v57 = vld [vmem:[%s5052_s7 + $0x1] ss:$0 sm:$0xff] }
0x18f4   :  { %v4378_v37 = vpop.eup %4377 }
0x18f5   :  { %v3177_v38 = vsel %vm174_vm2, %v4378_v37, 0.0  ;;  %v3349_v60 = vpop.permute.xlu1 %3348 }
0x18f6   :  { %3178 = vadd.xlane.f32.xlu0 %v3177_v38  ;;  %v3363_v0 = vsel %vm1524_vm4, %v3361_v63, %v3349_v60  ;;  %v3826_v63 = vld [vmem:[%s5053_s9 + $0x1] ss:$0 sm:$0xff] }
0x190c   :  { %3260 = vrot.lane.b32.xlu0 %v4793_v32, %s5071_s30  ;;  %v3768_v32 = vld [vmem:[%s5046_s4 + $0x20] sm:$0xff] }
0x190d   :  { %v4263_v47 = vpack.c.bf16 %v3769_v46, %v3768_v32  ;;  %v3822_v46 = vld [vmem:[%s5051_s11 + $0x1] ss:$0 sm:$0xff] }
0x190f   :  { %4264 = vmatprep.subr.bf16.mxu0 %v4263_v47 }
0x1910   :  { %3346 = vrot.lane.b32.xlu0 %v2924_v11, %s5073_s16 }
0x197f   :  { %v3176_v39 = vpop.xlane.xlu0 %3175 }
0x1980   :  { %4379 = vrcp.f32 %v3176_v39 }
0x1983   :  { %v3179_v40 = vpop.xlane.xlu0 %3178 }
0x1984   :  { %4381 = vrcp.f32 %v3179_v40 }
0x1987   :  { %v3261_v41 = vpop.permute.xlu0 %3260 }
0x1988   :  { %4170 = vmatpush3.msra.mxu1 %v3261_v41 }
0x198a   :  { %v4380_v42 = vpop.eup %4379 }
0x198b   :  { %v3181_v43 = vmul.f32 %v4380_v42, %v4376_v36  ;;  %v3347_v58 = vpop.permute.xlu0 %3346  ;;  %v3782_v36 = vld [vmem:[%s5049_s8 + $0x60] sm:$0xff] }
0x198c   :  { %v3362_v61 = vsel %vm1524_vm4, %v3360_v59, %v3347_v58 }
0x198d   :  { %4167 = vmatmul.mubr.msk.f32.vlgmr.msra.gmra.mrb[30].mxu0 %vm174_vm2, %v3181_v43 }
0x198e   :  { %v4382_v44 = vpop.eup %4381  ;;  %4266 = vmatpush3.bf16.msra.mxu0 %v4263_v47 }
0x198f   :  { %v3183_v45 = vmul.f32 %v4382_v44, %v4378_v37  ;;  %4268 = vmatprep.subr.bf16.mxu0 %v4267_v50  ;;  %v4287_v37 = vpack.c.bf16 %v3783_v33, %v3782_v36 }
0x1991   :  { %4172 = vmatmul.mubr.msk.f32.vlgmr.msra.gmra.mrb[40].mxu1 %vm174_vm2, %v3183_v45  ;;  %v3821_v45 = vld [vmem:[%s5050_s10 + $0x1] ss:$0 sm:$0xff] }
0x1992   :  { %4270 = vmatpush3.bf16.msra.mxu0 %v4267_v50 }
0x1993   :  { %4280 = vmatprep.subr.bf16.mxu0 %v4279_v19 }
0x1a60   :  { %v3256_v51 = vpop.f32.mrb[30].mxu0 }
0x1a61   :  { %3354 = vrot.lane.b32.xlu0 %v3256_v51, %s5074_s27  ;;  %v4168_v53 = vpop.f32.mrb[31].mxu0 }
0x1a64   :  { %v3332_v55 = vpop.f32.mrb[40].mxu1 }
0x1a65   :  { %3356 = vrot.lane.b32.xlu1 %v3332_v55, %s5074_s27  ;;  %v4173_v52 = vpop.f32.mrb[41].mxu1  ;;  %v3784_v55 = vld [vmem:[%s5049_s8 + $0x70] sm:$0xff] }
0x1a66   :  { %v3785_v52 = vld [vmem:[%s5049_s8 + $0x78] sm:$0xff] }
0x1a67   :  { %v4291_v56 = vpack.c.bf16 %v3785_v52, %v3784_v55 }
0x1ad3   :  { %v3355_v54 = vpop.permute.xlu0 %3354 }
0x1ad4   :  { %v3364_v62 = vsel %vm1527_vm3, %v3362_v61, %v3355_v54 }
0x1ad5   :  { %4182 = vmatprep.mubr.msk.f32.mxu0 %vm89_vm0, %v3364_v62 }
0x1ad7   :  { %v3357_v1 = vpop.permute.xlu1 %3356 }
0x1ad8   :  { %v3365_v3 = vsel %vm1527_vm3, %v3363_v0, %v3357_v1 }
0x1ad9   :  { %4183 = vmatmul.mubr.msk.f32.vlgmr.msra.gmra.mrb[32].mxu0 %vm89_vm0, %v3365_v3 }
0x1ada   :  { %4282 = vmatpush3.bf16.msra.mxu0 %v4279_v19 }
0x1adb   :  { %4284 = vmatprep.subr.bf16.mxu0 %v4283_v35 }
0x1ade   :  { %4286 = vmatpush3.bf16.msra.mxu0 %v4283_v35 }
0x1adf   :  { %4288 = vmatprep.subr.bf16.mxu0 %v4287_v37 }
0x1ae2   :  { %4290 = vmatpush3.bf16.msra.mxu0 %v4287_v37 }
0x1ae3   :  { %4292 = vmatprep.subr.bf16.mxu0 %v4291_v56 }
0x1ae6   :  { %4294 = vmatpush3.bf16.msra.mxu0 %v4291_v56 }
0x1bac   :  { %v4184_v5 = vpop.f32.mrb[32].mxu0 }
0x1bad   :  { %v3450_v6 = vadd.f32 %v4184_v5, %v3818_v2  ;;  %v3444_v7 = vpop.f32.mrb[33].mxu0 }
0x1bae   :  { %v3445_v13 = vadd.f32 %v3818_v2, %v3444_v7 }
0x1baf   :  { %v3454_v12 = vadd.f32 %v3450_v6, %v4782_v29 }
0x1bb0   :  { %v3453_v8 = vadd.f32 %v3445_v13, %v4780_v28  ;;  %v3773_v28 = vld [vmem:[%s5048_s6 + $0x20] sm:$0xff] }
0x1bb1   :  { %v3458_v4 = vsel %vm89_vm0, %v3454_v12, 0.0  ;;  %v4271_v24 = vpack.c.bf16 %v3774_v23, %v3773_v28 }
0x1bb2   :  { %3459 = vadd.xlane.f32.xlu1 %v3458_v4  ;;  %v3455_v9 = vsel %vm89_vm0, %v3453_v8, 0.0 }
0x1bb3   :  { %3456 = vadd.xlane.f32.xlu0 %v3455_v9  ;;  %4272 = vmatprep.subr.bf16.mxu1 %v4271_v24 }
0x1bb4   :  { %4274 = vmatpush3.bf16.msra.mxu1 %v4271_v24 }
0x1bb5   :  { %4276 = vmatprep.subr.bf16.mxu1 %v4275_v14 }
0x1bb8   :  { %4278 = vmatpush3.bf16.msra.mxu1 %v4275_v14 }
0x1c3f   :  { %v3460_v10 = vpop.xlane.xlu1 %3459 }
0x1c40   :  { %v3462_v11 = vmul.f32 0.03125, %v3460_v10  ;;  %v3457_v15 = vpop.xlane.xlu0 %3456 }
0x1c41   :  { %v3461_v16 = vmul.f32 0.03125, %v3457_v15 }
0x1c42   :  { %v3464_v17 = vsub.f32 %v3454_v12, %v3462_v11 }
0x1c43   :  { %v3463_v20 = vsub.f32 %v3453_v8, %v3461_v16 }
0x1c44   :  { %v3466_v18 = vmul.f32 %v3464_v17, %v3464_v17 }
0x1c45   :  { %v3465_v21 = vmul.f32 %v3463_v20, %v3463_v20 }
0x1c46   :  { %v3470_v29 = vsel %vm89_vm0, %v3466_v18, 0.0 }
0x1c47   :  { %v3467_v22 = vsel %vm89_vm0, %v3465_v21, 0.0 }
0x1c48   :  { %3468 = vadd.xlane.f32.xlu0 %v3467_v22 }
0x1c4c   :  { %3471 = vadd.xlane.f32.xlu0 %v3470_v29 }
0x1cd5   :  { %v3469_v38 = vpop.xlane.xlu0 %3468 }
0x1cd6   :  { %v3473_v39 = vmul.f32 0.03125, %v3469_v38 }
0x1cd8   :  { %v3475_v40 = vadd.f32 1e-05, %v3473_v39 }
0x1cd9   :  { %v3472_v41 = vpop.xlane.xlu0 %3471 }
0x1cda   :  { %4383 = vrsqrt.f32 %v3475_v40  ;;  %v3474_v42 = vmul.f32 0.03125, %v3472_v41 }
0x1cdc   :  { %v3476_v43 = vadd.f32 1e-05, %v3474_v42 }
0x1cde   :  { %4385 = vrsqrt.f32 %v3476_v43 }
0x1ce4   :  { %v4384_v44 = vpop.eup %4383 }
0x1ce5   :  { %v3479_v32 = vmul.f32 %v4384_v44, %v3463_v20 }
0x1ce7   :  { %v3487_v47 = vmul.f32 %v3821_v45, %v3479_v32 }
0x1ce8   :  { %v4386_v48 = vpop.eup %4385 }
0x1ce9   :  { %v3480_v49 = vmul.f32 %v4386_v48, %v3464_v17  ;;  %v3495_v50 = vadd.f32 %v3822_v46, %v3487_v47 }
0x1ceb   :  { %v3488_v51 = vmul.f32 %v3821_v45, %v3480_v49  ;;  %4193 = vmatprep.mubr.msk.f32.mxu1 %vm89_vm0, %v3495_v50 }
0x1ced   :  { %v3496_v53 = vadd.f32 %v3822_v46, %v3488_v51 }
0x1cef   :  { %4194 = vmatmul.mubr.msk.f32.vlgmr.msra.gmra.mrb[42].mxu1 %vm89_vm0, %v3496_v53 }
0x1dc2   :  { %v4195_v58 = vpop.f32.mrb[42].mxu1 }
0x1dc3   :  { %v3581_v59 = vadd.f32 %v4195_v58, %v3823_v57  ;;  %v3575_v60 = vpop.f32.mrb[43].mxu1 }
0x1dc4   :  { %v3576_v61 = vadd.f32 %v3823_v57, %v3575_v60 }
0x1dc5   :  { %v3585_v62 = vmax.f32 %v3581_v59, 0.0 }
0x1dc6   :  { %v3584_v54 = vmax.f32 %v3576_v61, 0.0 }
0x1dc8   :  { %4212 = vmatprep.mubr.msk.f32.mxu0 %vm1757_vm5, %v3584_v54 }
0x1dc9   :  { %4213 = vmatmul.mubr.msk.f32.vlgmr.msra.gmra.mrb[34].mxu0 %vm1757_vm5, %v3585_v62 }
0x1e9c   :  { %v4214_v0 = vpop.f32.mrb[34].mxu0 }
0x1e9d   :  { %v3670_v1 = vadd.f32 %v4214_v0, %v3826_v63  ;;  %v3664_v3 = vpop.f32.mrb[35].mxu0 }
0x1e9e   :  { %v3665_v2 = vadd.f32 %v3826_v63, %v3664_v3 }
0x1e9f   :  { %v3674_v5 = vadd.f32 %v3670_v1, %v3496_v53 }
0x1ea0   :  { %v3673_v6 = vadd.f32 %v3665_v2, %v3495_v50 }
0x1ea1   :  { %v3678_v7 = vsel %vm89_vm0, %v3674_v5, 0.0 }
0x1ea2   :  { %3679 = vadd.xlane.f32.xlu0 %v3678_v7  ;;  %v3675_v13 = vsel %vm89_vm0, %v3673_v6, 0.0 }
0x1ea3   :  { %3676 = vadd.xlane.f32.xlu1 %v3675_v13 }
0x1f2f   :  { %v3680_v12 = vpop.xlane.xlu0 %3679 }
0x1f30   :  { %v3682_v8 = vmul.f32 0.03125, %v3680_v12  ;;  %v3677_v4 = vpop.xlane.xlu1 %3676 }
0x1f31   :  { %v3681_v9 = vmul.f32 0.03125, %v3677_v4 }
0x1f32   :  { %v3684_v10 = vsub.f32 %v3674_v5, %v3682_v8 }
0x1f33   :  { %v3683_v11 = vsub.f32 %v3673_v6, %v3681_v9 }
0x1f34   :  { %v3686_v15 = vmul.f32 %v3684_v10, %v3684_v10 }
0x1f35   :  { %v3685_v16 = vmul.f32 %v3683_v11, %v3683_v11 }
0x1f36   :  { %v3690_v17 = vsel %vm89_vm0, %v3686_v15, 0.0 }
0x1f37   :  { %3691 = vadd.xlane.f32.xlu0 %v3690_v17  ;;  %v3687_v20 = vsel %vm89_vm0, %v3685_v16, 0.0 }
0x1f38   :  { %3688 = vadd.xlane.f32.xlu1 %v3687_v20 }
0x1fc4   :  { %v3692_v21 = vpop.xlane.xlu0 %3691 }
0x1fc5   :  { %v3694_v22 = vmul.f32 0.03125, %v3692_v21  ;;  %v3689_v18 = vpop.xlane.xlu1 %3688 }
0x1fc6   :  { %v3693_v29 = vmul.f32 0.03125, %v3689_v18 }
0x1fc7   :  { %v3696_v28 = vadd.f32 1e-05, %v3694_v22 }
0x1fc8   :  { %v3695_v23 = vadd.f32 1e-05, %v3693_v29 }
0x1fc9   :  { %4387 = vrsqrt.f32 %v3696_v28 }
0x1fca   :  { %4389 = vrsqrt.f32 %v3695_v23 }
0x1fd3   :  { %v4388_v24 = vpop.eup %4387 }
0x1fd4   :  { %v4390_v26 = vpop.eup %4389  ;;  %v3700_v14 = vmul.f32 %v4388_v24, %v3684_v10 }
0x1fd5   :  { %v3699_v30 = vmul.f32 %v4390_v26, %v3683_v11 }
0x1fd6   :  { %v3708_v31 = vmul.f32 %v3829_v25, %v3700_v14 }
0x1fd7   :  { %v3707_v19 = vmul.f32 %v3829_v25, %v3699_v30 }
0x1fd8   :  { %v3716_v34 = vadd.f32 %v3830_v27, %v3708_v31 }
0x1fd9   :  { %v3715_v35 = vadd.f32 %v3830_v27, %v3707_v19 }
0x1fda   :  { %3718 = vst.msk [vmem:[%s5056_s14 + $0x8] sm:$0xff] %vm89_vm0, %v3716_v34 }
0x1fdb   :  { %3717 = vst.msk [vmem:[%s5056_s14] sm:$0xff] %vm89_vm0, %v3715_v35 }

</bundles_post_ra>
